<compile_context>
chip_gen: v6e
topology: v6e:2x2x1
jax: 0.10.0
libtpu: 0.0.40
codegen_flags: <defaults>
</compile_context>

<pallas_src>
import functools

import jax
import jax.numpy as jnp
from jax import lax
from jax.experimental import pallas as pl
from jax.experimental.pallas import tpu as pltpu


# ----------------------------------------------------------------------------
# Pallas kernel: fused RepResblock forward, whole (small) batch per invocation.
# ----------------------------------------------------------------------------
def rep_resblock_kernel(
    x_ref,                    # (N, H, W*Cin)        f32  lane-dense input
    wa_ref, ba_ref,           # (3, W*Cin, W*Cm) bf16, (1, W*Cm) f32  (cv1 fused)
    wb_ref, bb_ref,           # (3, W*Cm,  W*Co) bf16, (1, W*Co) f32  (cv2 fused)
    out_ref,                  # (N, H, W*Co)         f32  lane-dense output
    xpad_ref,                 # scratch (N*(H+2), W*Cin) bf16  (row-halo only)
    ypad_ref,                 # scratch (N*(H+2), W*Cm)  bf16
    *, slope1, slope2,        # PReLU slopes: 1-relu_alpha1, 1-relu_alpha_act
):
    N, H, WCin = x_ref.shape
    WCm = wa_ref.shape[2]
    WCo = wb_ref.shape[2]
    Hp = H + 2

    # ---- zero ONLY the per-batch row halos (2 rows each, lane-dense) --------
    zx = jnp.zeros((1, WCin), jnp.bfloat16)
    zy = jnp.zeros((1, WCm), jnp.bfloat16)
    for n in range(N):
        b = n * Hp
        xpad_ref[b:b + 1, :] = zx
        xpad_ref[b + H + 1:b + H + 2, :] = zx
        ypad_ref[b:b + 1, :] = zy
        ypad_ref[b + H + 1:b + H + 2, :] = zy

    # Hoisted bias broadcasts (accumulator init values).
    bias_a = jnp.broadcast_to(ba_ref[...], (H, WCm))
    bias_b = jnp.broadcast_to(bb_ref[...], (H, WCo))

    for n in range(N):
        b = n * Hp
        xf = x_ref[n]                                          # (H, WCin) f32
        xpad_ref[b + 1:b + H + 1, :] = xf.astype(jnp.bfloat16)

        # ---- cv1: fused 3x3 conv == 3 block-tridiagonal matmuls -------------
        # Row tap dy reads padded rows [b+dy : b+dy+H]; W-direction taps and
        # zero-padding live inside the (W*Cin, W*Cm) block-tridiagonal weight.
        acc1 = bias_a
        for dy in range(3):
            acc1 = acc1 + jnp.dot(
                xpad_ref[b + dy:b + dy + H, :], wa_ref[dy],
                preferred_element_type=jnp.float32)
        y = jnp.where(acc1 > 0, acc1, slope1 * acc1)           # RepReLU (cv1.act)
        ypad_ref[b + 1:b + H + 1, :] = y.astype(jnp.bfloat16)

        # ---- cv2: fused 3x3 conv, no ReLU ------------------------------------
        acc2 = bias_b
        for dy in range(3):
            acc2 = acc2 + jnp.dot(
                ypad_ref[b + dy:b + dy + H, :], wb_ref[dy],
                preferred_element_type=jnp.float32)

        # ---- skip add (downsample == Identity) + final RepReLU, f32 ---------
        s = xf + acc2
        out_ref[n] = jnp.where(s > 0, s, slope2 * s)           # lane-dense vst


# ----------------------------------------------------------------------------
# Trace-time fusion helpers.
# ----------------------------------------------------------------------------
def _fuse_repconv(w3, w1, s3, b3, s1, b1, conv_alpha):
    """Fold eval-mode BN + 1x1 branch + conv_alpha blend into one 3x3 + bias.

    w3: (3,3,Cin,Cout) HWIO; w1: (Cin,Cout); s*/b*: (1,Cout) folded BN.
    Returns f32 fused (3,3,Cin,Cout) weight and (1,Cout) bias.
    """
    wf = conv_alpha * (w3 * s3)                            # BN scale + alpha
    wf = wf.at[1, 1].add((1.0 - conv_alpha) * (w1 * s1))   # 1x1 -> center tap
    bf = conv_alpha * b3 + (1.0 - conv_alpha) * b1
    return wf, bf


def _tridiag_weights(w, W):
    """(3,3,Cin,Cout) fused 3x3 kernel -> (3, W*Cin, W*Cout) bf16 per-dy
    block-tridiagonal matrices for the lane-dense (rows, W*C) formulation.

    A[dy][w_in*Cin+ci, w_out*Cout+co] = w[dy, w_in-w_out+1, ci, co] when
    |w_in - w_out| <= 1, else 0 (edge blocks implement W zero-padding)."""
    _, _, Cin, Cout = w.shape
    wi = jnp.arange(W)[:, None]                      # w_in
    wo = jnp.arange(W)[None, :]                      # w_out
    sel = ((wi - wo + 1)[:, :, None] == jnp.arange(3)[None, None, :])
    sel = sel.astype(w.dtype)                        # (W, W, 3)
    a = jnp.einsum("pqd,edio->epiqo", sel, w)        # (3, W, Cin, W, Cout)
    return a.reshape(3, W * Cin, W * Cout).astype(jnp.bfloat16)


# ----------------------------------------------------------------------------
# Wrapper: trace-time RepVGG fusion + single pallas_call (no grid).
# ----------------------------------------------------------------------------
def rep_resblock(x_nhwc, p):
    N, H, W, Cin = x_nhwc.shape
    Cm = p["w3a"].shape[-1]
    Co = p["w3b"].shape[-1]
    # Identity-downsample path only (fail loudly otherwise).
    assert Cin == Co, "RepResblock kernel: requires c1 == c2 (stride=1 path)."

    wa_f, ba = _fuse_repconv(p["w3a"], p["w1a"], p["bna_s"], p["bna_b"],
                             p["bnax_s"], p["bnax_b"], p["conv_alpha1"])
    wb_f, bb = _fuse_repconv(p["w3b"], p["w1b"], p["bnb_s"], p["bnb_b"],
                             p["bnbx_s"], p["bnbx_b"], p["conv_alpha2"])

    wa_ld = _tridiag_weights(wa_f, W)                      # (3, W*Cin, W*Cm) bf16
    wb_ld = _tridiag_weights(wb_f, W)                      # (3, W*Cm,  W*Co) bf16
    ba_ld = jnp.tile(ba, (1, W)).astype(jnp.float32)       # (1, W*Cm)
    bb_ld = jnp.tile(bb, (1, W)).astype(jnp.float32)       # (1, W*Co)

    slope1 = float(1.0 - p["relu_alpha1"])                 # F.prelu(x, 1-alpha)
    slope2 = float(1.0 - p["relu_alpha_act"])

    x_ld = x_nhwc.reshape(N, H, W * Cin)                   # contiguous view

    kernel = functools.partial(rep_resblock_kernel,
                               slope1=slope1, slope2=slope2)

    WC_in, WC_m, WC_o = W * Cin, W * Cm, W * Co
    flops = 2 * 3 * N * H * (WC_in * WC_m + WC_m * WC_o)
    bytes_accessed = (x_ld.size * 4 + N * H * WC_o * 4
                      + (wa_ld.size + wb_ld.size) * 2
                      + (ba_ld.size + bb_ld.size) * 4)

    vmem = pl.BlockSpec(memory_space=pltpu.MemorySpace.VMEM)
    out_ld = pl.pallas_call(
        kernel,
        out_shape=jax.ShapeDtypeStruct((N, H, WC_o), jnp.float32),
        in_specs=[vmem] * 5,
        out_specs=vmem,
        scratch_shapes=[
            pltpu.VMEM((N * (H + 2), WC_in), jnp.bfloat16),   # xpad (row halo)
            pltpu.VMEM((N * (H + 2), WC_m), jnp.bfloat16),    # ypad (row halo)
        ],
        cost_estimate=pl.CostEstimate(flops=flops, transcendentals=0,
                                      bytes_accessed=bytes_accessed),
    )(x_ld, wa_ld, ba_ld, wb_ld, bb_ld)

    # lane-dense (N, H, W*Co) -> NHWC; contiguous reinterpretation only.
    return out_ld.reshape(N, H, W, Co)


# ----------------------------------------------------------------------------
# Pure-JAX reference (unfused, f32) using lax.conv — correctness oracle.
# ----------------------------------------------------------------------------
def rep_resblock_ref(x_nhwc, p):
    dn = ("NHWC", "HWIO", "NHWC")

    def conv3(x, w):
        return lax.conv_general_dilated(x, w, (1, 1), ((1, 1), (1, 1)),
                                        dimension_numbers=dn)

    def conv1(x, wmat):
        return lax.conv_general_dilated(x, wmat[None, None], (1, 1),
                                        ((0, 0), (0, 0)), dimension_numbers=dn)

    def prelu(x, alpha):
        w = 1.0 - alpha
        return jnp.where(x > 0, x, w * x)

    y1 = conv3(x_nhwc, p["w3a"]) * p["bna_s"] + p["bna_b"]
    y2 = conv1(x_nhwc, p["w1a"]) * p["bnax_s"] + p["bnax_b"]
    y = p["conv_alpha1"] * y1 + (1.0 - p["conv_alpha1"]) * y2
    y = prelu(y, p["relu_alpha1"])
    z1 = conv3(y, p["w3b"]) * p["bnb_s"] + p["bnb_b"]
    z2 = conv1(y, p["w1b"]) * p["bnbx_s"] + p["bnbx_b"]
    z = p["conv_alpha2"] * z1 + (1.0 - p["conv_alpha2"]) * z2
    s = x_nhwc + z
    return prelu(s, p["relu_alpha_act"])


# ----------------------------------------------------------------------------
# Deterministic parameter construction (mirrors the module __init__ shapes).
# ----------------------------------------------------------------------------
def make_params(key, c1, c2, e=1):
    c_ = int(c2 * e)
    ks = jax.random.split(key, 12)
    eps = 1e-5

    def fold_bn(gamma, beta, mean, var):
        scale = gamma / jnp.sqrt(var + eps)
        bias = beta - mean * scale
        return scale[None, :], bias[None, :]             # (1, C)

    def bn_params(k, c):
        k1, k2, k3, k4 = jax.random.split(k, 4)
        gamma = jax.random.uniform(k1, (c,), jnp.float32, 0.5, 1.5)
        beta = 0.1 * jax.random.normal(k2, (c,), jnp.float32)
        mean = 0.1 * jax.random.normal(k3, (c,), jnp.float32)
        var = jax.random.uniform(k4, (c,), jnp.float32, 0.5, 1.5)
        return fold_bn(gamma, beta, mean, var)

    # cv1: Conv2d(c1, c_, 3), torch OIHW -> HWIO.
    w3a_oihw = 0.1 * jax.random.normal(ks[0], (c_, c1, 3, 3), jnp.float32)
    w3a = jnp.transpose(w3a_oihw, (2, 3, 1, 0))
    # cv1.conv1x: identity + 1e-6 init, (c_, c1) OI -> (c1, c_) IO.
    w1a = (jnp.eye(max(c1, c_), dtype=jnp.float32) + 1e-6)[:c_, :c1].T
    bna_s, bna_b = bn_params(ks[1], c_)
    bnax_s, bnax_b = bn_params(ks[2], c_)

    # cv2: Conv2d(c_, c2, 3)
    w3b_oihw = 0.1 * jax.random.normal(ks[3], (c2, c_, 3, 3), jnp.float32)
    w3b = jnp.transpose(w3b_oihw, (2, 3, 1, 0))
    w1b = (jnp.eye(max(c_, c2), dtype=jnp.float32) + 1e-6)[:c2, :c_].T
    bnb_s, bnb_b = bn_params(ks[4], c2)
    bnbx_s, bnbx_b = bn_params(ks[5], c2)

    return dict(
        w3a=w3a, w1a=w1a, bna_s=bna_s, bna_b=bna_b, bnax_s=bnax_s, bnax_b=bnax_b,
        w3b=w3b, w1b=w1b, bnb_s=bnb_s, bnb_b=bnb_b, bnbx_s=bnbx_s, bnbx_b=bnbx_b,
        conv_alpha1=0.75, relu_alpha1=0.6, conv_alpha2=0.8, relu_alpha_act=0.9,
    )


if __name__ == "__main__":
    # RepResblock(c1=8, c2=8, stride=1)  -> downsample = Identity
    # W * C = 16 * 8 = 128 -> exactly one lane group per row.
    N, C, H, W = 2, 8, 16, 16
    key = jax.random.PRNGKey(0)
    kx, kp = jax.random.split(key)

    x_nchw = jax.random.normal(kx, (N, C, H, W), jnp.float32)   # PyTorch layout
    x_nhwc = jnp.transpose(x_nchw, (0, 2, 3, 1))                # kernel layout

    params = make_params(kp, C, C, e=1)

    out = rep_resblock(x_nhwc, params)
    out = jax.block_until_ready(out)

    ref = rep_resblock_ref(x_nhwc, params)
    # bf16 matmul operands + bf16 intermediate activation (f32 accumulation)
    # introduce ~1e-2 abs error here.
    max_err = float(jnp.max(jnp.abs(out - ref)))
    assert max_err < 5e-2, f"mismatch vs reference: {max_err}"

    out_nchw = jnp.transpose(out, (0, 3, 1, 2))                 # back to NCHW
    assert out_nchw.shape == (N, C, H, W)

    print("KERNEL_OK")
</pallas_src>

<mosaic_0001>
module attributes {stable_mosaic.version = 11 : i64} {
  func.func @rep_resblock_kernel(%arg0: memref<2x16x128xf32, #tpu.memory_space<vmem>>, %arg1: memref<3x128x128xbf16, #tpu.memory_space<vmem>>, %arg2: memref<1x128xf32, #tpu.memory_space<vmem>>, %arg3: memref<3x128x128xbf16, #tpu.memory_space<vmem>>, %arg4: memref<1x128xf32, #tpu.memory_space<vmem>>, %arg5: memref<2x16x128xf32, #tpu.memory_space<vmem>>, %arg6: memref<36x128xbf16, #tpu.memory_space<vmem>>, %arg7: memref<36x128xbf16, #tpu.memory_space<vmem>>) attributes {dimension_semantics = [], scalar_prefetch = 0 : i64, scratch_operands = 2 : i64, tpu.core_type = #tpu.core_type<tc>} {
    %cst = arith.constant 0.000000e+00 : bf16
    %0 = vector.broadcast %cst : bf16 to vector<1x128xbf16>
    %cst_0 = arith.constant 0.000000e+00 : bf16
    %1 = vector.broadcast %cst_0 : bf16 to vector<1x128xbf16>
    %c0 = arith.constant 0 : index
    %c0_1 = arith.constant 0 : index
    %2 = vector.load %arg6[%c0, %c0_1] : memref<36x128xbf16, #tpu.memory_space<vmem>>, vector<1x128xbf16>
    tpu.vector_store %arg6[%c0, %c0_1], %0 {strides = array<i32>} : memref<36x128xbf16, #tpu.memory_space<vmem>>, vector<1x128xbf16>,
    %c17 = arith.constant 17 : index
    %c0_2 = arith.constant 0 : index
    %3 = vector.load %arg6[%c17, %c0_2] : memref<36x128xbf16, #tpu.memory_space<vmem>>, vector<1x128xbf16>
    tpu.vector_store %arg6[%c17, %c0_2], %0 {strides = array<i32>} : memref<36x128xbf16, #tpu.memory_space<vmem>>, vector<1x128xbf16>,
    %c0_3 = arith.constant 0 : index
    %c0_4 = arith.constant 0 : index
    %4 = vector.load %arg7[%c0_3, %c0_4] : memref<36x128xbf16, #tpu.memory_space<vmem>>, vector<1x128xbf16>
    tpu.vector_store %arg7[%c0_3, %c0_4], %1 {strides = array<i32>} : memref<36x128xbf16, #tpu.memory_space<vmem>>, vector<1x128xbf16>,
    %c17_5 = arith.constant 17 : index
    %c0_6 = arith.constant 0 : index
    %5 = vector.load %arg7[%c17_5, %c0_6] : memref<36x128xbf16, #tpu.memory_space<vmem>>, vector<1x128xbf16>
    tpu.vector_store %arg7[%c17_5, %c0_6], %1 {strides = array<i32>} : memref<36x128xbf16, #tpu.memory_space<vmem>>, vector<1x128xbf16>,
    %c18 = arith.constant 18 : index
    %c0_7 = arith.constant 0 : index
    %6 = vector.load %arg6[%c18, %c0_7] : memref<36x128xbf16, #tpu.memory_space<vmem>>, vector<1x128xbf16>
    tpu.vector_store %arg6[%c18, %c0_7], %0 {strides = array<i32>} : memref<36x128xbf16, #tpu.memory_space<vmem>>, vector<1x128xbf16>,
    %c35 = arith.constant 35 : index
    %c0_8 = arith.constant 0 : index
    %7 = vector.load %arg6[%c35, %c0_8] : memref<36x128xbf16, #tpu.memory_space<vmem>>, vector<1x128xbf16>
    tpu.vector_store %arg6[%c35, %c0_8], %0 {strides = array<i32>} : memref<36x128xbf16, #tpu.memory_space<vmem>>, vector<1x128xbf16>,
    %c18_9 = arith.constant 18 : index
    %c0_10 = arith.constant 0 : index
    %8 = vector.load %arg7[%c18_9, %c0_10] : memref<36x128xbf16, #tpu.memory_space<vmem>>, vector<1x128xbf16>
    tpu.vector_store %arg7[%c18_9, %c0_10], %1 {strides = array<i32>} : memref<36x128xbf16, #tpu.memory_space<vmem>>, vector<1x128xbf16>,
    %c35_11 = arith.constant 35 : index
    %c0_12 = arith.constant 0 : index
    %9 = vector.load %arg7[%c35_11, %c0_12] : memref<36x128xbf16, #tpu.memory_space<vmem>>, vector<1x128xbf16>
    tpu.vector_store %arg7[%c35_11, %c0_12], %1 {strides = array<i32>} : memref<36x128xbf16, #tpu.memory_space<vmem>>, vector<1x128xbf16>,
    %c0_13 = arith.constant 0 : index
    %c0_14 = arith.constant 0 : index
    %10 = vector.load %arg2[%c0_13, %c0_14] : memref<1x128xf32, #tpu.memory_space<vmem>>, vector<1x128xf32>
    %11 = vector.shape_cast %10 : vector<1x128xf32> to vector<1x128xf32>
    %12 = vector.broadcast %11 : vector<1x128xf32> to vector<16x128xf32>
    %c0_15 = arith.constant 0 : index
    %c0_16 = arith.constant 0 : index
    %13 = vector.load %arg4[%c0_15, %c0_16] : memref<1x128xf32, #tpu.memory_space<vmem>>, vector<1x128xf32>
    %14 = vector.shape_cast %13 : vector<1x128xf32> to vector<1x128xf32>
    %15 = vector.broadcast %14 : vector<1x128xf32> to vector<16x128xf32>
    %c0_17 = arith.constant 0 : index
    %c0_18 = arith.constant 0 : index
    %c0_19 = arith.constant 0 : index
    %16 = vector.load %arg0[%c0_17, %c0_18, %c0_19] : memref<2x16x128xf32, #tpu.memory_space<vmem>>, vector<1x16x128xf32>
    %17 = vector.shape_cast %16 : vector<1x16x128xf32> to vector<16x128xf32>
    %18 = arith.truncf %17 : vector<16x128xf32> to vector<16x128xbf16>
    %c1 = arith.constant 1 : index
    %c0_20 = arith.constant 0 : index
    %19 = vector.load %arg6[%c1, %c0_20] : memref<36x128xbf16, #tpu.memory_space<vmem>>, vector<16x128xbf16>
    tpu.vector_store %arg6[%c1, %c0_20], %18 {strides = array<i32>} : memref<36x128xbf16, #tpu.memory_space<vmem>>, vector<16x128xbf16>,
    %c0_21 = arith.constant 0 : index
    %c0_22 = arith.constant 0 : index
    %20 = vector.load %arg6[%c0_21, %c0_22] : memref<36x128xbf16, #tpu.memory_space<vmem>>, vector<16x128xbf16>
    %c0_23 = arith.constant 0 : index
    %c0_24 = arith.constant 0 : index
    %c0_25 = arith.constant 0 : index
    %21 = vector.load %arg1[%c0_23, %c0_24, %c0_25] : memref<3x128x128xbf16, #tpu.memory_space<vmem>>, vector<1x128x128xbf16>
    %22 = vector.shape_cast %21 : vector<1x128x128xbf16> to vector<128x128xbf16>
    %cst_26 = arith.constant dense<0.000000e+00> : vector<16x128xf32>
    %23 = tpu.matmul %20, %22, %cst_26 {dimension_numbers = #tpu.dot_dimension_numbers<[1], [0], [0], [1], [0, 0, 1, 1], [], []>} : vector<16x128xbf16>, vector<128x128xbf16>, vector<16x128xf32> -> vector<16x128xf32>
    %24 = arith.addf %12, %23 : vector<16x128xf32>
    %c1_27 = arith.constant 1 : index
    %c0_28 = arith.constant 0 : index
    %25 = vector.load %arg6[%c1_27, %c0_28] : memref<36x128xbf16, #tpu.memory_space<vmem>>, vector<16x128xbf16>
    %c1_29 = arith.constant 1 : index
    %c0_30 = arith.constant 0 : index
    %c0_31 = arith.constant 0 : index
    %26 = vector.load %arg1[%c1_29, %c0_30, %c0_31] : memref<3x128x128xbf16, #tpu.memory_space<vmem>>, vector<1x128x128xbf16>
    %27 = vector.shape_cast %26 : vector<1x128x128xbf16> to vector<128x128xbf16>
    %cst_32 = arith.constant dense<0.000000e+00> : vector<16x128xf32>
    %28 = tpu.matmul %25, %27, %cst_32 {dimension_numbers = #tpu.dot_dimension_numbers<[1], [0], [0], [1], [0, 0, 1, 1], [], []>} : vector<16x128xbf16>, vector<128x128xbf16>, vector<16x128xf32> -> vector<16x128xf32>
    %29 = arith.addf %24, %28 : vector<16x128xf32>
    %c2 = arith.constant 2 : index
    %c0_33 = arith.constant 0 : index
    %30 = vector.load %arg6[%c2, %c0_33] : memref<36x128xbf16, #tpu.memory_space<vmem>>, vector<16x128xbf16>
    %c2_34 = arith.constant 2 : index
    %c0_35 = arith.constant 0 : index
    %c0_36 = arith.constant 0 : index
    %31 = vector.load %arg1[%c2_34, %c0_35, %c0_36] : memref<3x128x128xbf16, #tpu.memory_space<vmem>>, vector<1x128x128xbf16>
    %32 = vector.shape_cast %31 : vector<1x128x128xbf16> to vector<128x128xbf16>
    %cst_37 = arith.constant dense<0.000000e+00> : vector<16x128xf32>
    %33 = tpu.matmul %30, %32, %cst_37 {dimension_numbers = #tpu.dot_dimension_numbers<[1], [0], [0], [1], [0, 0, 1, 1], [], []>} : vector<16x128xbf16>, vector<128x128xbf16>, vector<16x128xf32> -> vector<16x128xf32>
    %34 = arith.addf %29, %33 : vector<16x128xf32>
    %cst_38 = arith.constant 0.000000e+00 : f32
    %35 = vector.broadcast %cst_38 : f32 to vector<16x128xf32>
    %36 = arith.cmpf ogt, %34, %35 : vector<16x128xf32>
    %cst_39 = arith.constant 4.000000e-01 : f32
    %37 = vector.broadcast %cst_39 : f32 to vector<16x128xf32>
    %38 = arith.mulf %37, %34 : vector<16x128xf32>
    %39 = arith.select %36, %34, %38 : vector<16x128xi1>, vector<16x128xf32>
    %40 = arith.truncf %39 : vector<16x128xf32> to vector<16x128xbf16>
    %c1_40 = arith.constant 1 : index
    %c0_41 = arith.constant 0 : index
    %41 = vector.load %arg7[%c1_40, %c0_41] : memref<36x128xbf16, #tpu.memory_space<vmem>>, vector<16x128xbf16>
    tpu.vector_store %arg7[%c1_40, %c0_41], %40 {strides = array<i32>} : memref<36x128xbf16, #tpu.memory_space<vmem>>, vector<16x128xbf16>,
    %c0_42 = arith.constant 0 : index
    %c0_43 = arith.constant 0 : index
    %42 = vector.load %arg7[%c0_42, %c0_43] : memref<36x128xbf16, #tpu.memory_space<vmem>>, vector<16x128xbf16>
    %c0_44 = arith.constant 0 : index
    %c0_45 = arith.constant 0 : index
    %c0_46 = arith.constant 0 : index
    %43 = vector.load %arg3[%c0_44, %c0_45, %c0_46] : memref<3x128x128xbf16, #tpu.memory_space<vmem>>, vector<1x128x128xbf16>
    %44 = vector.shape_cast %43 : vector<1x128x128xbf16> to vector<128x128xbf16>
    %cst_47 = arith.constant dense<0.000000e+00> : vector<16x128xf32>
    %45 = tpu.matmul %42, %44, %cst_47 {dimension_numbers = #tpu.dot_dimension_numbers<[1], [0], [0], [1], [0, 0, 1, 1], [], []>} : vector<16x128xbf16>, vector<128x128xbf16>, vector<16x128xf32> -> vector<16x128xf32>
    %46 = arith.addf %15, %45 : vector<16x128xf32>
    %c1_48 = arith.constant 1 : index
    %c0_49 = arith.constant 0 : index
    %47 = vector.load %arg7[%c1_48, %c0_49] : memref<36x128xbf16, #tpu.memory_space<vmem>>, vector<16x128xbf16>
    %c1_50 = arith.constant 1 : index
    %c0_51 = arith.constant 0 : index
    %c0_52 = arith.constant 0 : index
    %48 = vector.load %arg3[%c1_50, %c0_51, %c0_52] : memref<3x128x128xbf16, #tpu.memory_space<vmem>>, vector<1x128x128xbf16>
    %49 = vector.shape_cast %48 : vector<1x128x128xbf16> to vector<128x128xbf16>
    %cst_53 = arith.constant dense<0.000000e+00> : vector<16x128xf32>
    %50 = tpu.matmul %47, %49, %cst_53 {dimension_numbers = #tpu.dot_dimension_numbers<[1], [0], [0], [1], [0, 0, 1, 1], [], []>} : vector<16x128xbf16>, vector<128x128xbf16>, vector<16x128xf32> -> vector<16x128xf32>
    %51 = arith.addf %46, %50 : vector<16x128xf32>
    %c2_54 = arith.constant 2 : index
    %c0_55 = arith.constant 0 : index
    %52 = vector.load %arg7[%c2_54, %c0_55] : memref<36x128xbf16, #tpu.memory_space<vmem>>, vector<16x128xbf16>
    %c2_56 = arith.constant 2 : index
    %c0_57 = arith.constant 0 : index
    %c0_58 = arith.constant 0 : index
    %53 = vector.load %arg3[%c2_56, %c0_57, %c0_58] : memref<3x128x128xbf16, #tpu.memory_space<vmem>>, vector<1x128x128xbf16>
    %54 = vector.shape_cast %53 : vector<1x128x128xbf16> to vector<128x128xbf16>
    %cst_59 = arith.constant dense<0.000000e+00> : vector<16x128xf32>
    %55 = tpu.matmul %52, %54, %cst_59 {dimension_numbers = #tpu.dot_dimension_numbers<[1], [0], [0], [1], [0, 0, 1, 1], [], []>} : vector<16x128xbf16>, vector<128x128xbf16>, vector<16x128xf32> -> vector<16x128xf32>
    %56 = arith.addf %51, %55 : vector<16x128xf32>
    %57 = arith.addf %17, %56 : vector<16x128xf32>
    %cst_60 = arith.constant 0.000000e+00 : f32
    %58 = vector.broadcast %cst_60 : f32 to vector<16x128xf32>
    %59 = arith.cmpf ogt, %57, %58 : vector<16x128xf32>
    %cst_61 = arith.constant 1.000000e-01 : f32
    %60 = vector.broadcast %cst_61 : f32 to vector<16x128xf32>
    %61 = arith.mulf %60, %57 : vector<16x128xf32>
    %62 = arith.select %59, %57, %61 : vector<16x128xi1>, vector<16x128xf32>
    %c0_62 = arith.constant 0 : index
    %c0_63 = arith.constant 0 : index
    %c0_64 = arith.constant 0 : index
    %63 = vector.load %arg5[%c0_62, %c0_63, %c0_64] : memref<2x16x128xf32, #tpu.memory_space<vmem>>, vector<1x16x128xf32>
    %64 = vector.shape_cast %63 : vector<1x16x128xf32> to vector<16x128xf32>
    %65 = vector.shape_cast %62 : vector<16x128xf32> to vector<1x16x128xf32>
    tpu.vector_store %arg5[%c0_62, %c0_63, %c0_64], %65 {strides = array<i32>} : memref<2x16x128xf32, #tpu.memory_space<vmem>>, vector<1x16x128xf32>,
    %c1_65 = arith.constant 1 : index
    %c0_66 = arith.constant 0 : index
    %c0_67 = arith.constant 0 : index
    %66 = vector.load %arg0[%c1_65, %c0_66, %c0_67] : memref<2x16x128xf32, #tpu.memory_space<vmem>>, vector<1x16x128xf32>
    %67 = vector.shape_cast %66 : vector<1x16x128xf32> to vector<16x128xf32>
    %68 = arith.truncf %67 : vector<16x128xf32> to vector<16x128xbf16>
    %c19 = arith.constant 19 : index
    %c0_68 = arith.constant 0 : index
    %69 = vector.load %arg6[%c19, %c0_68] : memref<36x128xbf16, #tpu.memory_space<vmem>>, vector<16x128xbf16>
    tpu.vector_store %arg6[%c19, %c0_68], %68 {strides = array<i32>} : memref<36x128xbf16, #tpu.memory_space<vmem>>, vector<16x128xbf16>,
    %c18_69 = arith.constant 18 : index
    %c0_70 = arith.constant 0 : index
    %70 = vector.load %arg6[%c18_69, %c0_70] : memref<36x128xbf16, #tpu.memory_space<vmem>>, vector<16x128xbf16>
    %c0_71 = arith.constant 0 : index
    %c0_72 = arith.constant 0 : index
    %c0_73 = arith.constant 0 : index
    %71 = vector.load %arg1[%c0_71, %c0_72, %c0_73] : memref<3x128x128xbf16, #tpu.memory_space<vmem>>, vector<1x128x128xbf16>
    %72 = vector.shape_cast %71 : vector<1x128x128xbf16> to vector<128x128xbf16>
    %cst_74 = arith.constant dense<0.000000e+00> : vector<16x128xf32>
    %73 = tpu.matmul %70, %72, %cst_74 {dimension_numbers = #tpu.dot_dimension_numbers<[1], [0], [0], [1], [0, 0, 1, 1], [], []>} : vector<16x128xbf16>, vector<128x128xbf16>, vector<16x128xf32> -> vector<16x128xf32>
    %74 = arith.addf %12, %73 : vector<16x128xf32>
    %c19_75 = arith.constant 19 : index
    %c0_76 = arith.constant 0 : index
    %75 = vector.load %arg6[%c19_75, %c0_76] : memref<36x128xbf16, #tpu.memory_space<vmem>>, vector<16x128xbf16>
    %c1_77 = arith.constant 1 : index
    %c0_78 = arith.constant 0 : index
    %c0_79 = arith.constant 0 : index
    %76 = vector.load %arg1[%c1_77, %c0_78, %c0_79] : memref<3x128x128xbf16, #tpu.memory_space<vmem>>, vector<1x128x128xbf16>
    %77 = vector.shape_cast %76 : vector<1x128x128xbf16> to vector<128x128xbf16>
    %cst_80 = arith.constant dense<0.000000e+00> : vector<16x128xf32>
    %78 = tpu.matmul %75, %77, %cst_80 {dimension_numbers = #tpu.dot_dimension_numbers<[1], [0], [0], [1], [0, 0, 1, 1], [], []>} : vector<16x128xbf16>, vector<128x128xbf16>, vector<16x128xf32> -> vector<16x128xf32>
    %79 = arith.addf %74, %78 : vector<16x128xf32>
    %c20 = arith.constant 20 : index
    %c0_81 = arith.constant 0 : index
    %80 = vector.load %arg6[%c20, %c0_81] : memref<36x128xbf16, #tpu.memory_space<vmem>>, vector<16x128xbf16>
    %c2_82 = arith.constant 2 : index
    %c0_83 = arith.constant 0 : index
    %c0_84 = arith.constant 0 : index
    %81 = vector.load %arg1[%c2_82, %c0_83, %c0_84] : memref<3x128x128xbf16, #tpu.memory_space<vmem>>, vector<1x128x128xbf16>
    %82 = vector.shape_cast %81 : vector<1x128x128xbf16> to vector<128x128xbf16>
    %cst_85 = arith.constant dense<0.000000e+00> : vector<16x128xf32>
    %83 = tpu.matmul %80, %82, %cst_85 {dimension_numbers = #tpu.dot_dimension_numbers<[1], [0], [0], [1], [0, 0, 1, 1], [], []>} : vector<16x128xbf16>, vector<128x128xbf16>, vector<16x128xf32> -> vector<16x128xf32>
    %84 = arith.addf %79, %83 : vector<16x128xf32>
    %cst_86 = arith.constant 0.000000e+00 : f32
    %85 = vector.broadcast %cst_86 : f32 to vector<16x128xf32>
    %86 = arith.cmpf ogt, %84, %85 : vector<16x128xf32>
    %cst_87 = arith.constant 4.000000e-01 : f32
    %87 = vector.broadcast %cst_87 : f32 to vector<16x128xf32>
    %88 = arith.mulf %87, %84 : vector<16x128xf32>
    %89 = arith.select %86, %84, %88 : vector<16x128xi1>, vector<16x128xf32>
    %90 = arith.truncf %89 : vector<16x128xf32> to vector<16x128xbf16>
    %c19_88 = arith.constant 19 : index
    %c0_89 = arith.constant 0 : index
    %91 = vector.load %arg7[%c19_88, %c0_89] : memref<36x128xbf16, #tpu.memory_space<vmem>>, vector<16x128xbf16>
    tpu.vector_store %arg7[%c19_88, %c0_89], %90 {strides = array<i32>} : memref<36x128xbf16, #tpu.memory_space<vmem>>, vector<16x128xbf16>,
    %c18_90 = arith.constant 18 : index
    %c0_91 = arith.constant 0 : index
    %92 = vector.load %arg7[%c18_90, %c0_91] : memref<36x128xbf16, #tpu.memory_space<vmem>>, vector<16x128xbf16>
    %c0_92 = arith.constant 0 : index
    %c0_93 = arith.constant 0 : index
    %c0_94 = arith.constant 0 : index
    %93 = vector.load %arg3[%c0_92, %c0_93, %c0_94] : memref<3x128x128xbf16, #tpu.memory_space<vmem>>, vector<1x128x128xbf16>
    %94 = vector.shape_cast %93 : vector<1x128x128xbf16> to vector<128x128xbf16>
    %cst_95 = arith.constant dense<0.000000e+00> : vector<16x128xf32>
    %95 = tpu.matmul %92, %94, %cst_95 {dimension_numbers = #tpu.dot_dimension_numbers<[1], [0], [0], [1], [0, 0, 1, 1], [], []>} : vector<16x128xbf16>, vector<128x128xbf16>, vector<16x128xf32> -> vector<16x128xf32>
    %96 = arith.addf %15, %95 : vector<16x128xf32>
    %c19_96 = arith.constant 19 : index
    %c0_97 = arith.constant 0 : index
    %97 = vector.load %arg7[%c19_96, %c0_97] : memref<36x128xbf16, #tpu.memory_space<vmem>>, vector<16x128xbf16>
    %c1_98 = arith.constant 1 : index
    %c0_99 = arith.constant 0 : index
    %c0_100 = arith.constant 0 : index
    %98 = vector.load %arg3[%c1_98, %c0_99, %c0_100] : memref<3x128x128xbf16, #tpu.memory_space<vmem>>, vector<1x128x128xbf16>
    %99 = vector.shape_cast %98 : vector<1x128x128xbf16> to vector<128x128xbf16>
    %cst_101 = arith.constant dense<0.000000e+00> : vector<16x128xf32>
    %100 = tpu.matmul %97, %99, %cst_101 {dimension_numbers = #tpu.dot_dimension_numbers<[1], [0], [0], [1], [0, 0, 1, 1], [], []>} : vector<16x128xbf16>, vector<128x128xbf16>, vector<16x128xf32> -> vector<16x128xf32>
    %101 = arith.addf %96, %100 : vector<16x128xf32>
    %c20_102 = arith.constant 20 : index
    %c0_103 = arith.constant 0 : index
    %102 = vector.load %arg7[%c20_102, %c0_103] : memref<36x128xbf16, #tpu.memory_space<vmem>>, vector<16x128xbf16>
    %c2_104 = arith.constant 2 : index
    %c0_105 = arith.constant 0 : index
    %c0_106 = arith.constant 0 : index
    %103 = vector.load %arg3[%c2_104, %c0_105, %c0_106] : memref<3x128x128xbf16, #tpu.memory_space<vmem>>, vector<1x128x128xbf16>
    %104 = vector.shape_cast %103 : vector<1x128x128xbf16> to vector<128x128xbf16>
    %cst_107 = arith.constant dense<0.000000e+00> : vector<16x128xf32>
    %105 = tpu.matmul %102, %104, %cst_107 {dimension_numbers = #tpu.dot_dimension_numbers<[1], [0], [0], [1], [0, 0, 1, 1], [], []>} : vector<16x128xbf16>, vector<128x128xbf16>, vector<16x128xf32> -> vector<16x128xf32>
    %106 = arith.addf %101, %105 : vector<16x128xf32>
    %107 = arith.addf %67, %106 : vector<16x128xf32>
    %cst_108 = arith.constant 0.000000e+00 : f32
    %108 = vector.broadcast %cst_108 : f32 to vector<16x128xf32>
    %109 = arith.cmpf ogt, %107, %108 : vector<16x128xf32>
    %cst_109 = arith.constant 1.000000e-01 : f32
    %110 = vector.broadcast %cst_109 : f32 to vector<16x128xf32>
    %111 = arith.mulf %110, %107 : vector<16x128xf32>
    %112 = arith.select %109, %107, %111 : vector<16x128xi1>, vector<16x128xf32>
    %c1_110 = arith.constant 1 : index
    %c0_111 = arith.constant 0 : index
    %c0_112 = arith.constant 0 : index
    %113 = vector.load %arg5[%c1_110, %c0_111, %c0_112] : memref<2x16x128xf32, #tpu.memory_space<vmem>>, vector<1x16x128xf32>
    %114 = vector.shape_cast %113 : vector<1x16x128xf32> to vector<16x128xf32>
    %115 = vector.shape_cast %112 : vector<16x128xf32> to vector<1x16x128xf32>
    tpu.vector_store %arg5[%c1_110, %c0_111, %c0_112], %115 {strides = array<i32>} : memref<2x16x128xf32, #tpu.memory_space<vmem>>, vector<1x16x128xf32>,
    return
  }
}

</mosaic_0001>

<bundles_post_ra>
// kernel: tpu_custom_call.1
= control target key start
LH: loop header
LB: loop body
LE: loop exit
PB: predicated region body
PF: predicated region fallthrough
CT: control target
= control target key end

     0   :  { %10 = vsyncpa [#allocation5], 0  ;;  %s2774_s0 = inlined_call_operand.hbm [shape: f32[2,16,128], index: 0, kind: input, shape index: {}]   ;;  %s2775_s1 = inlined_call_operand.hbm [shape: bf16[3,128,128], index: 1, kind: input, shape index: {}]   ;;  %s2776_s2 = inlined_call_operand.vmem [shape: f32[1,128], index: 2, kind: input, shape index: {}]   ;;  %s2777_s3 = inlined_call_operand.hbm [shape: bf16[3,128,128], index: 3, kind: input, shape index: {}]   ;;  %s2778_s4 = inlined_call_operand.vmem [shape: f32[1,128], index: 4, kind: input, shape index: {}]   ;;  %s2779_s5 = inlined_call_operand.hbm [shape: f32[2,16,128], index: 5, kind: output, shape index: {}]  }
   0x1   :  { %11 = vsyncpa [#allocation8], 0 }
   0x2   :  { %12 = vsyncpa [#allocation6], 0  ;;  %s2463_s18 = smov [#allocation7]  }
   0x3   :  { %s30_s19 = sshll.u32 %s2463_s18, 4  ;;  %s31_s19 = int_to_ptr.vmem [resolvable:$true] %s30_s19 }
   0x4   :  { %s2385_s20 = scalar_lea.vmem %s31_s19, 3072  ;;  %p2390_p1 = scmp.lt.s32.totalorder %s31_s19, %s31_s19 }
   0x5   :  { %p2386_p0 = scmp.ne.s32.totalorder %s31_s19, %s2385_s20  ;;  %p2391_p2 = scmp.lt.s32.totalorder %s2385_s20, %s2385_s20 }
   0x7   :  { %p2392_p3 = por %p2391_p2, %p2390_p1 }
   0x9   :  { %p2393_p4 = pnand %p2392_p3, %p2386_p0 }
   0xb   :  { %2396 = shalt.err (!%p2393_p4)
}
   0xc   :  { %s2464_s21 = smov 64   ;;  %s2465_s22 = smov 4  }
   0xd   :  { %36 = dma.hbm_to_vmem [thread:$0]  %s2775_s1, 3072, %s31_s19, [#allocation8], %s2464_s21, %s2464_s21, %s2465_s22  }
   0xe   :  { %s2466_s25 = smov [#allocation4]  }
   0xf   :  { %s18_s26 = sshll.u32 %s2466_s25, 4  ;;  %s19_s26 = int_to_ptr.vmem [resolvable:$true] %s18_s26 }
  0x10   :  { %s2405_s27 = scalar_lea.vmem %s19_s26, 512  ;;  %p2410_p6 = scmp.lt.s32.totalorder %s19_s26, %s19_s26 }
  0x11   :  { %p2406_p5 = scmp.ne.s32.totalorder %s19_s26, %s2405_s27  ;;  %p2411_p7 = scmp.lt.s32.totalorder %s2405_s27, %s2405_s27 }
  0x13   :  { %p2412_p8 = por %p2411_p7, %p2410_p6 }
  0x15   :  { %p2413_p9 = pnand %p2412_p8, %p2406_p5 }
  0x17   :  { %2416 = shalt.err (!%p2413_p9)
}
  0x18   :  { %s2467_s28 = smov 128   ;;  %s2468_s29 = smov 8  }
  0x19   :  { %24 = dma.hbm_to_vmem [thread:$0]  %s2774_s0, 512, %s19_s26, [#allocation5], %s2467_s28, %s2467_s28, %s2468_s29  }
  0x1a   :  { %s2469_s1 = smov [#allocation9]  }
  0x1b   :  { %s44_s7 = sshll.u32 %s2469_s1, 4  ;;  %s45_s7 = int_to_ptr.vmem [resolvable:$true] %s44_s7 }
  0x1c   :  { %s2425_s8 = scalar_lea.vmem %s45_s7, 3072  ;;  %p2430_p11 = scmp.lt.s32.totalorder %s45_s7, %s45_s7 }
  0x1d   :  { %p2426_p10 = scmp.ne.s32.totalorder %s45_s7, %s2425_s8  ;;  %p2431_p12 = scmp.lt.s32.totalorder %s2425_s8, %s2425_s8 }
  0x1f   :  { %p2432_p13 = por %p2431_p12, %p2430_p11 }
  0x21   :  { %p2433_p0 = pnand %p2432_p13, %p2426_p10 }
  0x23   :  { %2436 = shalt.err (!%p2433_p0)
}
  0x24   :  { %50 = dma.hbm_to_vmem [thread:$0]  %s2777_s3, 3072, %s45_s7, [#allocation8], %s2464_s21, %s2464_s21, %s2465_s22  }
  0x25   :  { %2457 = dma.done.wait [#allocation5], 512  }
  0x26   :  { %2458 = vsyncadd [#allocation5], 4294966784 }
  0x27   :  { %2459 = dma.done.wait [#allocation8], 6144  }
  0x28   :  { %2460 = vsyncadd [#allocation8], 4294961152  ;;  %v2470_v0 = vmov 0.0   ;;  %vm2471_vm0 = vmmov 0   ;;  %v2263_v1 = vld [vmem:[#allocation7 + $0x38] sm:$0xff]   ;;  %v2265_v3 = vld [vmem:[#allocation7 + $0x30] sm:$0xff]  }
  0x29   :  { %2013 = vmatprep.subr.bf16.mxu0 %v2470_v0  ;;  %2033 = vmatprep.subr.bf16.mxu1 %v2470_v0  ;;  %v2264_v2 = vld [vmem:[#allocation7 + $0x78] sm:$0xff]   ;;  %v2266_v4 = vld [vmem:[#allocation7 + $0x70] sm:$0xff]   ;;  %v2267_v5 = vld [vmem:[#allocation7 + $0x28] sm:$0xff]   ;;  %vm63_vm1 = vcmask 1040384   ;;  %vm64_vm2 = vsmask.f32 256 }
  0x2a   :  { %2029 = vmatprep.mubr.msk.bf16.mxu0 %vm2471_vm0, %v2470_v0  ;;  %2049 = vmatprep.mubr.msk.bf16.mxu1 %vm2471_vm0, %v2470_v0  ;;  %v2268_v6 = vld [vmem:[#allocation7 + $0x68] sm:$0xff]   ;;  %vm69_vm3 = vsmask.f32 7938  ;;  %v2269_v7 = vld [vmem:[#allocation7 + $0x20] sm:$0xff]   ;;  %vm2528_vm4 = vmand %vm63_vm1, %vm64_vm2  ;;  %vm119_vm6 = vsmask.f32 4368 }
  0x2b   :  { %2014 = vmatpush3.bf16.msra.mxu0 %v2263_v1  ;;  %2034 = vmatpush3.bf16.msra.mxu1 %v2264_v2  ;;  %v2270_v8 = vld [vmem:[#allocation7 + $0x60] sm:$0xff]   ;;  %vm2533_vm5 = vmand %vm63_vm1, %vm69_vm3  ;;  %v2271_v11 = vld [vmem:[#allocation7 + $0x18] sm:$0xff]   ;;  %vm141_vm7 = vcmask 1043456   ;;  %vm293_vm10 = vsmask.f32 7424  ;;  %vm419_vm11 = vcmask 1046528  }
  0x2c   :  { %2015 = vmatprep.subr.bf16.mxu0 %v2470_v0  ;;  %2035 = vmatprep.subr.bf16.mxu1 %v2470_v0  ;;  %v2272_v12 = vld [vmem:[#allocation7 + $0x58] sm:$0xff]   ;;  %v71_v14 = vld [vmem:[#allocation2 + $0x8] sm:$0x1]  ;;  %v2273_v16 = vld [vmem:[#allocation7 + $0x10] sm:$0xff]   ;;  %vm80_vm12 = vcmask 1041409  }
  0x2d   :  { %v66_v13 = vld [vmem:[#allocation2] sm:$0x1]  ;;  %v111_v15 = vld [vmem:[#allocation4] sm:$0xff]  ;;  %v72_v18 = vsel %vm2533_vm5, 0, %v71_v14  ;;  %v112_v19 = vld [vmem:[#allocation4 + $0x8] sm:$0xff] }
  0x2e   :  { %v67_v17 = vsel %vm2528_vm4, 0, %v66_v13  ;;  %v1897_v20 = vpack.c.bf16 %v111_v15, %v111_v15  ;;  %73 = vst [vmem:[#allocation2 + $0x8] sm:$0x1] %v72_v18  ;;  %v1898_v21 = vpack.c.bf16 %v112_v19, %v112_v19  ;;  %v2274_v22 = vld [vmem:[#allocation7 + $0x50] sm:$0xff]   ;;  %vm2547_vm8 = vmor %vm64_vm2, %vm119_vm6  ;;  %v2275_v30 = vld [vmem:[#allocation7 + $0x8] sm:$0xff]   ;;  %vm966_vm6 = vcmask 1041408  }
  0x2f   :  { %2016 = vmatpush3.bf16.msra.mxu0 %v2265_v3  ;;  %2036 = vmatpush3.bf16.msra.mxu1 %v2266_v4  ;;  %68 = vst [vmem:[#allocation2] sm:$0x1] %v67_v17  ;;  %vm2553_vm9 = vmand %vm141_vm7, %vm69_vm3  ;;  %v2276_v32 = vld [vmem:[#allocation7 + $0x48] sm:$0xff]   ;;  %v2277_v39 = vld [vmem:[#allocation7] sm:$0xff]   ;;  %vm81_vm13 = vsmask.f32 1280 }
  0x30   :  { %2017 = vmatprep.subr.bf16.mxu0 %v2470_v0  ;;  %2037 = vmatprep.subr.bf16.mxu1 %v2470_v0  ;;  %v122_v23 = vshrl.u32 %v1897_v20, 16  ;;  %v125_v24 = vshll.u32 %v1897_v20, 16  ;;  %v130_v26 = vshrl.u32 %v1898_v21, 16  ;;  %v133_v27 = vshll.u32 %v1898_v21, 16  ;;  %v2278_v40 = vld [vmem:[#allocation7 + $0x40] sm:$0xff]   ;;  %v2280_v44 = vld [vmem:[#allocation7 + $0xb8] sm:$0xff]   ;;  %vm2608_vm14 = vmand %vm80_vm12, %vm81_vm13 }
  0x31   :  { %v2283_v50 = vld [vmem:[#allocation7 + $0xb0] sm:$0xff]   ;;  %v2284_v56 = vld [vmem:[#allocation7 + $0xa8] sm:$0xff]   ;;  %v2285_v62 = vld [vmem:[#allocation7 + $0xa0] sm:$0xff]   ;;  %vm86_vm15 = vsmask.f32 7942  ;;  %vm960_vm3 = vcmask 1043457  }
  0x32   :  { %v124_v28 = vrot.slane %v122_v23, 7  ;;  %v132_v31 = vrot.slane %v130_v26, 7  ;;  %v2286_v1 = vld [vmem:[#allocation7 + $0x98] sm:$0xff]   ;;  %v2287_v2 = vld [vmem:[#allocation7 + $0x90] sm:$0xff]   ;;  %v2288_v3 = vld [vmem:[#allocation7 + $0x88] sm:$0xff]  }
  0x33   :  { %2018 = vmatpush3.bf16.msra.mxu0 %v2267_v5  ;;  %2038 = vmatpush3.bf16.msra.mxu1 %v2268_v6  ;;  %v2289_v4 = vld [vmem:[#allocation7 + $0x80] sm:$0xff]   ;;  %v2291_v6 = vld [vmem:[#allocation9 + $0x38] sm:$0xff]   ;;  %v2294_v13 = vld [vmem:[#allocation9 + $0x28] sm:$0xff]   ;;  %vm936_vm2 = vsmask.f32 5392 }
  0x34   :  { %2019 = vmatprep.subr.bf16.mxu0 %v2470_v0  ;;  %2039 = vmatprep.subr.bf16.mxu1 %v2470_v0  ;;  %v127_v33 = vor.u32 %v125_v24, %v124_v28  ;;  %v128_v34 = vrot.slane %v124_v28, 4  ;;  %v135_v35 = vor.u32 %v133_v27, %v132_v31  ;;  %v137_v36 = vrot.slane %v132_v31, 4  ;;  %v2295_v14 = vld [vmem:[#allocation9 + $0x70] sm:$0xff]   ;;  %v2296_v15 = vld [vmem:[#allocation9 + $0x20] sm:$0xff]   ;;  %v2297_v18 = vld [vmem:[#allocation9 + $0x68] sm:$0xff]  }
  0x35   :  { %v147_v38 = vld [vmem:[#allocation2 + $0x8] sm:$0x1]  ;;  %v2298_v19 = vld [vmem:[#allocation9 + $0x18] sm:$0xff]   ;;  %v2300_v21 = vld [vmem:[#allocation9 + $0x10] sm:$0xff]  }
  0x36   :  { %v143_v37 = vld [vmem:[#allocation2] sm:$0xf]  ;;  %v136_v41 = vsel %vm2547_vm8, %v128_v34, %v135_v35  ;;  %v148_v43 = vsel %vm2528_vm4, %v137_v36, %v147_v38  ;;  %v2299_v20 = vld [vmem:[#allocation9 + $0x60] sm:$0xff]   ;;  %v2302_v10 = vld [vmem:[#allocation9 + $0x8] sm:$0xff]  }
  0x37   :  { %2020 = vmatpush3.bf16.msra.mxu0 %v2269_v7  ;;  %2040 = vmatpush3.bf16.msra.mxu1 %v2270_v8  ;;  %v144_v42 = vsel %vm2553_vm9, %v127_v33, %v143_v37  ;;  %146 = vst [vmem:[#allocation2 + $0x4] sm:$0xf] %v136_v41  ;;  %149 = vst [vmem:[#allocation2 + $0x8] sm:$0x1] %v148_v43  ;;  %v74_v7 = vld [vmem:[#allocation3] sm:$0x1] }
  0x38   :  { %2021 = vmatprep.subr.bf16.mxu0 %v2470_v0  ;;  %2041 = vmatprep.subr.bf16.mxu1 %v2470_v0  ;;  %145 = vst [vmem:[#allocation2] sm:$0xf] %v144_v42  ;;  %v75_v8 = vsel %vm2528_vm4, 0, %v74_v7  ;;  %v2303_v23 = vld [vmem:[#allocation9 + $0x50] sm:$0xff]   ;;  %v2304_v24 = vld [vmem:[#allocation9] sm:$0xff]   ;;  %v2305_v26 = vld [vmem:[#allocation9 + $0x48] sm:$0xff]  }
  0x39   :  { %76 = vst [vmem:[#allocation3] sm:$0x1] %v75_v8  ;;  %v2308_v27 = vld [vmem:[#allocation9 + $0x40] sm:$0xff]   ;;  %v2605_v28 = vld [vmem:[#allocation4 + $0x10] sm:$0xff]  ;;  %vm2617_vm1 = vmand %vm80_vm12, %vm86_vm15 }
  0x3a   :  { %v83_v31 = vld [vmem:[#allocation2 + $0x8] sm:$0x2]  ;;  %v88_v35 = vld [vmem:[#allocation2 + $0x10] sm:$0x2]  ;;  %v2621_v36 = vld [vmem:[#allocation4 + $0x18] sm:$0xff] }
  0x3b   :  { %2022 = vmatpush3.bf16.msra.mxu0 %v2271_v11  ;;  %2042 = vmatpush3.bf16.msra.mxu1 %v2272_v12  ;;  %v2292_v11 = vld [vmem:[#allocation9 + $0x30] sm:$0xff]   ;;  %v2293_v12 = vld [vmem:[#allocation9 + $0x78] sm:$0xff]   ;;  %v84_v33 = vsel %vm2608_vm14, 0, %v83_v31  ;;  %v89_v37 = vsel %vm2617_vm1, 0, %v88_v35  ;;  %v1902_v38 = vpack.c.bf16 %v2621_v36, %v2621_v36  ;;  %vm2635_vm7 = vmand %vm960_vm3, %vm86_vm15 }
  0x3c   :  { %2023 = vmatprep.subr.bf16.mxu0 %v2470_v0  ;;  %2043 = vmatprep.subr.bf16.mxu1 %v2470_v0  ;;  %85 = vst [vmem:[#allocation2 + $0x8] sm:$0x2] %v84_v33  ;;  %90 = vst [vmem:[#allocation2 + $0x10] sm:$0x2] %v89_v37  ;;  %v2357_v34 = vld [vmem:[#allocation9 + $0x58] sm:$0xff]  }
  0x3d   :  { %v948_v43 = vshrl.u32 %v1902_v38, 16  ;;  %vm2642_vm12 = vmand %vm966_vm6, %vm81_vm13 }
  0x3e   :  { %v266_v47 = vld [vmem:[#allocation2 + $0x4] sm:$0xf]  ;;  %v2282_v49 = vld [vmem:[#allocation2 + $0x8] ss:$0 sps:$4 sm:$0x11]  }
  0x3f   :  { %2024 = vmatpush3.bf16.msra.mxu0 %v2273_v16  ;;  %2044 = vmatpush3.bf16.msra.mxu1 %v2274_v22  ;;  %v2279_v45 = vld [vmem:[#allocation2] sm:$0xff]   ;;  %v302_v55 = vshll.u32 %v2282_v49, 16  ;;  %v421_v58 = vrot.slane %v2282_v49, 1  ;;  %v77_v16 = vld [vmem:[#allocation3 + $0x8] sm:$0x1] }
  0x40   :  { %2025 = vmatprep.subr.bf16.mxu0 %v2470_v0  ;;  %2045 = vmatprep.subr.bf16.mxu1 %v2470_v0  ;;  %v265_v46 = vld [vmem:[#allocation2] sm:$0xf]  ;;  %v78_v17 = vsel %vm2533_vm5, 0, %v77_v16  ;;  %vm2628_vm5 = vmor %vm81_vm13, %vm936_vm2 }
  0x41   :  { %v1788_v48 = vcombine.low %v265_v46, %v266_v47  ;;  %v398_v51 = vld [vmem:[#allocation2] sm:$0xe]  ;;  %v304_v60 = vrot.slane %v302_v55, 1  ;;  %79 = vst [vmem:[#allocation3 + $0x8] sm:$0x1] %v78_v17  ;;  %v950_v46 = vrot.slane %v948_v43, 6 }
  0x42   :  { %v1798_v52 = vcombine.low %v398_v51, %v266_v47  ;;  %v2301_v22 = vld [vmem:[#allocation9 + $0x58] sm:$0xff]  }
  0x43   :  { %2026 = vmatpush3.bf16.msra.mxu0 %v2275_v30  ;;  %2046 = vmatpush3.bf16.msra.mxu1 %v2276_v32  ;;  %v295_v53 = vshrl.u32 %v1788_v48, 16  ;;  %v297_v54 = vshll.u32 %v1788_v48, 16  ;;  %v1901_v32 = vpack.c.bf16 %v2605_v28, %v2605_v28  ;;  %v962_v51 = vld [vmem:[#allocation2 + $0x8] sm:$0xe]  ;;  %v968_v55 = vld [vmem:[#allocation2 + $0x10] sm:$0x3] }
  0x44   :  { %2027 = vmatprep.subr.bf16.mxu0 %v2470_v0  ;;  %2047 = vmatprep.subr.bf16.mxu1 %v2470_v0  ;;  %v420_v57 = vrot.slane %v1798_v52, 1  ;;  %v2307_v43 = vld [vmem:[#allocation9 + $0xb8] sm:$0xff]  }
  0x45   :  { %v299_v59 = vrot.slane %v297_v54, 1 }
  0x46   :  { %v422_v5 = vsel %vm419_vm11, %v420_v57, %v421_v58 }
  0x47   :  { %2028 = vmatpush3.bf16.msra.mxu0 %v2277_v39  ;;  %2048 = vmatpush3.bf16.msra.mxu1 %v2278_v40  ;;  %v300_v61 = vor.u32 %v299_v59, %v295_v53  ;;  %v939_v39 = vshrl.u32 %v1901_v32, 16  ;;  %v942_v40 = vshll.u32 %v1901_v32, 16 }
  0x48   :  { %2053 = vmatprep.subr.bf16.mxu0 %v2470_v0  ;;  %2073 = vmatprep.subr.bf16.mxu1 %v2470_v0  ;;  %v551_v37 = vld [vmem:[#allocation3 + $0x8] sm:$0x1] }
  0x49   :  { %v305_v63 = vsel %vm293_vm10, %v300_v61, %v304_v60  ;;  %v941_v41 = vrot.slane %v939_v39, 6  ;;  %v944_v42 = vrot.slane %v942_v40, 7 }
  0x4a   :  { %2030 = vmatmul.mubr.bf16.vlgmr.msra.gmra.mxu0 %v2279_v45  ;;  %2050 = vmatmul.mubr.bf16.vlgmr.msra.gmra.mxu1 %v305_v63 }
  0x4b   :  { %2054 = vmatpush3.bf16.msra.mxu0 %v2280_v44  ;;  %2069 = vmatprep.mubr.msk.bf16.mxu0 %vm2471_vm0, %v2470_v0  ;;  %v951_v44 = vshll.u32 %v1902_v38, 16  ;;  %v945_v45 = vor.u32 %v944_v42, %v941_v41 }
  0x4c   :  { %2055 = vmatprep.subr.bf16.mxu0 %v2470_v0  ;;  %2089 = vmatprep.mubr.msk.bf16.mxu1 %vm2471_vm0, %v2470_v0 }
  0x4d   :  { %2074 = vmatpush3.bf16.msra.mxu1 %v2291_v6  ;;  %v953_v47 = vrot.slane %v951_v44, 7  ;;  %v946_v48 = vrot.slane %v945_v45, 4 }
  0x4e   :  { %2075 = vmatprep.subr.bf16.mxu1 %v2470_v0 }
  0x4f   :  { %2056 = vmatpush3.bf16.msra.mxu0 %v2283_v50  ;;  %v954_v49 = vor.u32 %v953_v47, %v950_v46 }
  0x50   :  { %2057 = vmatprep.subr.bf16.mxu0 %v2470_v0 }
  0x51   :  { %2076 = vmatpush3.bf16.msra.mxu1 %v2292_v11  ;;  %v955_v52 = vsel %vm2628_vm5, %v946_v48, %v954_v49  ;;  %v956_v53 = vrot.slane %v954_v49, 4  ;;  %v2309_v48 = vld [vmem:[#allocation9 + $0xb0] sm:$0xff]  }
  0x52   :  { %2077 = vmatprep.subr.bf16.mxu1 %v2470_v0  ;;  %965 = vst [vmem:[#allocation2 + $0xc] sm:$0xf] %v955_v52 }
  0x53   :  { %2058 = vmatpush3.bf16.msra.mxu0 %v2284_v56  ;;  %v963_v56 = vsel %vm2635_vm7, %v945_v45, %v962_v51  ;;  %v969_v58 = vsel %vm2642_vm12, %v956_v53, %v968_v55  ;;  %v2312_v55 = vld [vmem:[#allocation7 + $0x38] sm:$0xff]  }
  0x54   :  { %2059 = vmatprep.subr.bf16.mxu0 %v2470_v0  ;;  %964 = vst [vmem:[#allocation2 + $0x8] sm:$0xe] %v963_v56  ;;  %970 = vst [vmem:[#allocation2 + $0x10] sm:$0x3] %v969_v58  ;;  %v2313_v56 = vld [vmem:[#allocation9 + $0xa8] sm:$0xff]  }
  0x55   :  { %2078 = vmatpush3.bf16.msra.mxu1 %v2294_v13 }
  0x56   :  { %2079 = vmatprep.subr.bf16.mxu1 %v2470_v0 }
  0x57   :  { %2060 = vmatpush3.bf16.msra.mxu0 %v2285_v62 }
  0x58   :  { %2061 = vmatprep.subr.bf16.mxu0 %v2470_v0 }
  0x59   :  { %2080 = vmatpush3.bf16.msra.mxu1 %v2296_v15 }
  0x5a   :  { %2081 = vmatprep.subr.bf16.mxu1 %v2470_v0 }
  0x5b   :  { %2062 = vmatpush3.bf16.msra.mxu0 %v2286_v1 }
  0x5c   :  { %2063 = vmatprep.subr.bf16.mxu0 %v2470_v0 }
  0x5d   :  { %2082 = vmatpush3.bf16.msra.mxu1 %v2298_v19 }
  0x5e   :  { %2083 = vmatprep.subr.bf16.mxu1 %v2470_v0 }
  0x5f   :  { %2064 = vmatpush3.bf16.msra.mxu0 %v2287_v2 }
  0x60   :  { %2065 = vmatprep.subr.bf16.mxu0 %v2470_v0 }
  0x61   :  { %2084 = vmatpush3.bf16.msra.mxu1 %v2300_v21 }
  0x62   :  { %2085 = vmatprep.subr.bf16.mxu1 %v2470_v0 }
  0x63   :  { %2066 = vmatpush3.bf16.msra.mxu0 %v2288_v3 }
  0x64   :  { %2067 = vmatprep.subr.bf16.mxu0 %v2470_v0 }
  0x65   :  { %2086 = vmatpush3.bf16.msra.mxu1 %v2302_v10 }
  0x66   :  { %2087 = vmatprep.subr.bf16.mxu1 %v2470_v0 }
  0x67   :  { %2068 = vmatpush3.bf16.msra.mxu0 %v2289_v4  ;;  %v2651_v4 = vld [vmem:[%s2776_s2] ss:$0 sm:$0xff] }
  0x68   :  { %2093 = vmatprep.subr.bf16.mxu0 %v2470_v0 }
  0x69   :  { %2088 = vmatpush3.bf16.msra.mxu1 %v2304_v24 }
  0x6a   :  { %2070 = vmatmul.mubr.bf16.vlgmr.msra.gmra.mxu0 %v422_v5  ;;  %2113 = vmatprep.subr.bf16.mxu1 %v2470_v0 }
  0x6b   :  { %2109 = vmatprep.mubr.msk.bf16.mxu0 %vm2471_vm0, %v2470_v0  ;;  %2094 = vmatpush3.bf16.msra.mxu0 %v2293_v12 }
  0x6c   :  { %2095 = vmatprep.subr.bf16.mxu0 %v2470_v0 }
  0x6f   :  { %2096 = vmatpush3.bf16.msra.mxu0 %v2295_v14 }
  0x70   :  { %2097 = vmatprep.subr.bf16.mxu0 %v2470_v0 }
  0x73   :  { %2098 = vmatpush3.bf16.msra.mxu0 %v2297_v18 }
  0x74   :  { %2099 = vmatprep.subr.bf16.mxu0 %v2470_v0 }
  0x77   :  { %2100 = vmatpush3.bf16.msra.mxu0 %v2299_v20 }
  0x78   :  { %2101 = vmatprep.subr.bf16.mxu0 %v2470_v0 }
  0x7b   :  { %2102 = vmatpush3.bf16.msra.mxu0 %v2301_v22 }
  0x7c   :  { %2103 = vmatprep.subr.bf16.mxu0 %v2470_v0 }
  0x7f   :  { %2104 = vmatpush3.bf16.msra.mxu0 %v2303_v23 }
  0x80   :  { %2105 = vmatprep.subr.bf16.mxu0 %v2470_v0 }
  0x83   :  { %2106 = vmatpush3.bf16.msra.mxu0 %v2305_v26  ;;  %v547_v26 = vld [vmem:[#allocation3] sm:$0xf] }
  0x84   :  { %2107 = vmatprep.subr.bf16.mxu0 %v2470_v0 }
  0x87   :  { %2108 = vmatpush3.bf16.msra.mxu0 %v2308_v27 }
  0x88   :  { %2133 = vmatprep.subr.bf16.mxu0 %v2470_v0 }
 0x10a   :  { %v256_v59 = vpop.f32.mrf.mxu0  ;;  %v389_v63 = vpop.f32.mrf.mxu1 }
 0x10b   :  { %v263_v5 = vadd.f32 %v2651_v4, %v256_v59  ;;  %v2314_v59 = vld [vmem:[#allocation7 + $0x30] sm:$0xff]  }
 0x10c   :  { %v2031_v60 = vpop.f32.mrf.mxu0  ;;  %v2051_v1 = vpop.f32.mrf.mxu1 }
 0x10d   :  { %v396_v6 = vadd.f32 %v389_v63, %v263_v5  ;;  %v2315_v60 = vld [vmem:[#allocation9 + $0xa0] sm:$0xff]   ;;  %v2319_v1 = vld [vmem:[#allocation9 + $0x90] sm:$0xff]  }
 0x10e   :  { %v259_v61 = vpop.f32.mrf.mxu0  ;;  %v392_v2 = vpop.f32.mrf.mxu1  ;;  %v2318_v63 = vld [vmem:[#allocation7 + $0x20] sm:$0xff]  }
 0x10f   :  { %v264_v7 = vadd.f32 %v2651_v4, %v259_v61  ;;  %v2316_v61 = vld [vmem:[#allocation7 + $0x28] sm:$0xff]  }
 0x110   :  { %v2032_v62 = vpop.f32.mrf.mxu0  ;;  %v2052_v3 = vpop.f32.mrf.mxu1 }
 0x111   :  { %v397_v13 = vadd.f32 %v392_v2, %v264_v7  ;;  %v2317_v62 = vld [vmem:[#allocation9 + $0x98] sm:$0xff]   ;;  %v2321_v3 = vld [vmem:[#allocation9 + $0x88] sm:$0xff]   ;;  %v2322_v7 = vld [vmem:[#allocation7 + $0x10] sm:$0xff]  }
 0x112   :  { %v2320_v2 = vld [vmem:[#allocation7 + $0x18] sm:$0xff]  }
 0x12a   :  { %v506_v8 = vpop.f32.mrf.mxu0 }
 0x12b   :  { %v513_v11 = vadd.f32 %v506_v8, %v396_v6  ;;  %v2323_v8 = vld [vmem:[#allocation9 + $0x80] sm:$0xff]  }
 0x12c   :  { %v2071_v12 = vpop.f32.mrf.mxu0 }
 0x12d   :  { %vm515_vm13 = vcmp.gt.f32.partialorder %v513_v11, 0.0  ;;  %v517_v14 = vmul.f32 0.4, %v513_v11  ;;  %v2681_v12 = vld [vmem:[#allocation2 + $0xc] sm:$0xf] }
 0x12e   :  { %v509_v15 = vpop.f32.mrf.mxu0 }
 0x12f   :  { %v519_v16 = vsel %vm515_vm13, %v513_v11, %v517_v14  ;;  %v514_v17 = vadd.f32 %v509_v15, %v397_v13  ;;  %v971_v11 = vld [vmem:[#allocation2 + $0x8] sm:$0xe]  ;;  %v2325_v15 = vld [vmem:[#allocation7 + $0x8] sm:$0xff]  }
 0x130   :  { %v1899_v18 = vpack.c.bf16 %v519_v16, %v519_v16  ;;  %v2072_v19 = vpop.f32.mrf.mxu0  ;;  %v2326_v16 = vld [vmem:[#allocation7 + $0x78] sm:$0xff]  }
 0x131   :  { %vm516_vm15 = vcmp.gt.f32.partialorder %v514_v17, 0.0  ;;  %v518_v20 = vmul.f32 0.4, %v514_v17 }
 0x132   :  { %v528_v21 = vshrl.u32 %v1899_v18, 16  ;;  %v531_v23 = vshll.u32 %v1899_v18, 16  ;;  %v2330_v18 = vld [vmem:[#allocation2 + $0x10] ss:$0 sps:$4 sm:$0x11]  }
 0x133   :  { %v520_v22 = vsel %vm516_vm15, %v514_v17, %v518_v20  ;;  %v1839_v17 = vcombine.low %v971_v11, %v2681_v12  ;;  %v2327_v20 = vld [vmem:[#allocation7] sm:$0xff]   ;;  %v2354_v11 = vld [vmem:[#allocation9 + $0x18] sm:$0xff]  }
 0x134   :  { %v530_v10 = vrot.slane %v528_v21, 7  ;;  %v1900_v24 = vpack.c.bf16 %v520_v22, %v520_v22  ;;  %v2328_v21 = vld [vmem:[#allocation7 + $0x70] sm:$0xff]  }
 0x135   :  { %v998_v22 = vrot.slane %v1839_v17, 1 }
 0x136   :  { %v533_v27 = vor.u32 %v531_v23, %v530_v10  ;;  %v536_v31 = vshrl.u32 %v1900_v24, 16  ;;  %v539_v35 = vshll.u32 %v1900_v24, 16  ;;  %v534_v38 = vrot.slane %v530_v10, 4  ;;  %v2331_v24 = vld [vmem:[#allocation7 + $0xb8] sm:$0xff]  }
 0x137   :  { %v999_v10 = vrot.slane %v2330_v18, 1  ;;  %v2365_v18 = vld [vmem:[#allocation9 + $0x40] sm:$0xff]  }
 0x138   :  { %v548_v32 = vsel %vm2553_vm9, %v533_v27, %v547_v26  ;;  %v538_v33 = vrot.slane %v536_v31, 7  ;;  %v2332_v26 = vld [vmem:[#allocation7 + $0x68] sm:$0xff]   ;;  %v2333_v27 = vld [vmem:[#allocation7 + $0xb0] sm:$0xff]   ;;  %v2334_v31 = vld [vmem:[#allocation7 + $0x60] sm:$0xff]  }
 0x139   :  { %549 = vst [vmem:[#allocation3] sm:$0xf] %v548_v32  ;;  %v1000_v23 = vsel %vm419_vm11, %v998_v22, %v999_v10  ;;  %v2335_v32 = vld [vmem:[#allocation7 + $0xa8] sm:$0xff]  }
 0x13a   :  { %v541_v39 = vor.u32 %v539_v35, %v538_v33  ;;  %v543_v40 = vrot.slane %v538_v33, 4  ;;  %v2336_v33 = vld [vmem:[#allocation7 + $0x58] sm:$0xff]   ;;  %v2343_v35 = vld [vmem:[#allocation2 + $0x10] ss:$0 sps:$4 sm:$0x33]  }
 0x13c   :  { %v542_v41 = vsel %vm2547_vm8, %v534_v38, %v541_v39  ;;  %v552_v42 = vsel %vm2528_vm4, %v543_v40, %v551_v37  ;;  %v2337_v37 = vld [vmem:[#allocation7 + $0xa0] sm:$0xff]   ;;  %v2338_v38 = vld [vmem:[#allocation7 + $0x50] sm:$0xff]   ;;  %v1115_v39 = vshrl.u32 %v1839_v17, 16  ;;  %v1118_v40 = vshll.u32 %v1839_v17, 16  ;;  %v2361_v17 = vld [vmem:[#allocation9 + $0x48] sm:$0xff]  }
 0x13d   :  { %550 = vst [vmem:[#allocation3 + $0x4] sm:$0xf] %v542_v41  ;;  %553 = vst [vmem:[#allocation3 + $0x8] sm:$0x1] %v552_v42  ;;  %v1123_v41 = vshrl.u32 %v2343_v35, 16  ;;  %v1126_v42 = vshll.u32 %v2343_v35, 16 }
 0x13e   :  { %vm1113_vm4 = vsmask.f32 6400  ;;  %vm1243_vm8 = vcmask 1045504  }
 0x140   :  { %v669_v44 = vld [vmem:[#allocation3] sm:$0xf] }
 0x141   :  { %v801_v5 = vld [vmem:[#allocation3] sm:$0xe] }
 0x144   :  { %v2306_v45 = vld [vmem:[#allocation3] sm:$0xff]   ;;  %v2661_v47 = vld [vmem:[#allocation3 + $0x8] ss:$0 sps:$4 sm:$0x11]  }
 0x145   :  { %v670_v29 = vld [vmem:[#allocation3 + $0x4] sm:$0xf]  ;;  %2090 = vmatmul.mubr.bf16.vlgmr.msra.gmra.mxu1 %v2306_v45  ;;  %v705_v51 = vshll.u32 %v2661_v47, 16  ;;  %v823_v14 = vrot.slane %v2661_v47, 1  ;;  %v1117_v45 = vrot.slane %v1115_v39, 1  ;;  %v1128_v47 = vrot.slane %v1126_v42, 2 }
 0x146   :  { %v1818_v46 = vcombine.low %v669_v44, %v670_v29  ;;  %2114 = vmatpush3.bf16.msra.mxu1 %v2307_v43  ;;  %2129 = vmatprep.mubr.msk.bf16.mxu1 %vm2471_vm0, %v2470_v0  ;;  %v1828_v6 = vcombine.low %v801_v5, %v670_v29  ;;  %v2339_v43 = vld [vmem:[#allocation7 + $0x98] sm:$0xff]   ;;  %v2340_v44 = vld [vmem:[#allocation7 + $0x48] sm:$0xff]   ;;  %v1120_v29 = vrot.slane %v1118_v40, 2  ;;  %v2351_v5 = vld [vmem:[#allocation9 + $0x70] sm:$0xff]  }
 0x147   :  { %2115 = vmatprep.subr.bf16.mxu1 %v2470_v0  ;;  %v707_v53 = vrot.slane %v705_v51, 1  ;;  %v2375_v40 = vld [vmem:[#allocation4] sm:$0xff] }
 0x148   :  { %v700_v49 = vshll.u32 %v1818_v46, 16  ;;  %v698_v9 = vshrl.u32 %v1818_v46, 16  ;;  %v822_v13 = vrot.slane %v1828_v6, 1  ;;  %v1125_v46 = vrot.slane %v1123_v41, 1  ;;  %v94_v6 = vld [vmem:[#allocation3 + $0x10] sm:$0x2] }
 0x149   :  { %v1121_v51 = vor.u32 %v1120_v29, %v1117_v45  ;;  %v95_v30 = vsel %vm2617_vm1, 0, %v94_v6 }
 0x14a   :  { %v702_v25 = vrot.slane %v700_v49, 1  ;;  %2116 = vmatpush3.bf16.msra.mxu1 %v2309_v48  ;;  %v824_v19 = vsel %vm419_vm11, %v822_v13, %v823_v14  ;;  %v2341_v48 = vld [vmem:[#allocation7 + $0x90] sm:$0xff]   ;;  %v2342_v49 = vld [vmem:[#allocation7 + $0x40] sm:$0xff]   ;;  %96 = vst [vmem:[#allocation3 + $0x10] sm:$0x2] %v95_v30  ;;  %v2358_v14 = vld [vmem:[#allocation9 + $0x8] sm:$0xff]  }
 0x14b   :  { %2117 = vmatprep.subr.bf16.mxu1 %v2470_v0  ;;  %v2356_v13 = vld [vmem:[#allocation9 + $0x10] sm:$0xff]  }
 0x14c   :  { %v703_v52 = vor.u32 %v702_v25, %v698_v9  ;;  %v1129_v9 = vor.u32 %v1128_v47, %v1125_v46  ;;  %v1223_v25 = vld [vmem:[#allocation2 + $0x8] sm:$0xc]  ;;  %v2376_v46 = vld [vmem:[#allocation4 + $0x8] sm:$0xff] }
 0x14e   :  { %v708_v58 = vsel %vm293_vm10, %v703_v52, %v707_v53  ;;  %2118 = vmatpush3.bf16.msra.mxu1 %v2313_v56  ;;  %v1130_v52 = vsel %vm1113_vm4, %v1121_v51, %v1129_v9  ;;  %v2344_v53 = vld [vmem:[#allocation7 + $0x88] sm:$0xff]   ;;  %v2345_v56 = vld [vmem:[#allocation7 + $0x80] sm:$0xff]  }
 0x14f   :  { %2110 = vmatmul.mubr.bf16.vlgmr.msra.gmra.mxu0 %v708_v58  ;;  %2119 = vmatprep.subr.bf16.mxu1 %v2470_v0 }
 0x150   :  { %2134 = vmatpush3.bf16.msra.mxu0 %v2312_v55  ;;  %2149 = vmatprep.mubr.msk.bf16.mxu0 %vm2471_vm0, %v2470_v0  ;;  %v1858_v55 = vcombine.low %v1223_v25, %v2681_v12  ;;  %v2355_v12 = vld [vmem:[#allocation9 + $0x60] sm:$0xff]  }
 0x151   :  { %2135 = vmatprep.subr.bf16.mxu0 %v2470_v0 }
 0x152   :  { %2120 = vmatpush3.bf16.msra.mxu1 %v2315_v60  ;;  %v1244_v58 = vrot.slane %v1858_v55, 2 }
 0x153   :  { %2121 = vmatprep.subr.bf16.mxu1 %v2470_v0 }
 0x154   :  { %2136 = vmatpush3.bf16.msra.mxu0 %v2314_v59  ;;  %v1245_v59 = vrot.slane %v2343_v35, 2 }
 0x155   :  { %2137 = vmatprep.subr.bf16.mxu0 %v2470_v0 }
 0x156   :  { %2122 = vmatpush3.bf16.msra.mxu1 %v2317_v62  ;;  %v1246_v60 = vsel %vm1243_vm8, %v1244_v58, %v1245_v59 }
 0x157   :  { %2123 = vmatprep.subr.bf16.mxu1 %v2470_v0 }
 0x158   :  { %2138 = vmatpush3.bf16.msra.mxu0 %v2316_v61  ;;  %v91_v61 = vld [vmem:[#allocation3 + $0x8] sm:$0x2] }
 0x159   :  { %2139 = vmatprep.subr.bf16.mxu0 %v2470_v0  ;;  %v92_v62 = vsel %vm2608_vm14, 0, %v91_v61 }
 0x15a   :  { %2124 = vmatpush3.bf16.msra.mxu1 %v2319_v1  ;;  %93 = vst [vmem:[#allocation3 + $0x8] sm:$0x2] %v92_v62  ;;  %v2348_v1 = vld [vmem:[#allocation9 + $0x30] sm:$0xff]  }
 0x15b   :  { %2125 = vmatprep.subr.bf16.mxu1 %v2470_v0 }
 0x15c   :  { %2140 = vmatpush3.bf16.msra.mxu0 %v2318_v63  ;;  %v2347_v63 = vld [vmem:[#allocation9 + $0x38] sm:$0xff]  }
 0x15d   :  { %2141 = vmatprep.subr.bf16.mxu0 %v2470_v0 }
 0x15e   :  { %2126 = vmatpush3.bf16.msra.mxu1 %v2321_v3  ;;  %v2350_v3 = vld [vmem:[#allocation9 + $0x28] sm:$0xff]  }
 0x15f   :  { %2127 = vmatprep.subr.bf16.mxu1 %v2470_v0 }
 0x160   :  { %2142 = vmatpush3.bf16.msra.mxu0 %v2320_v2  ;;  %v2349_v2 = vld [vmem:[#allocation9 + $0x78] sm:$0xff]  }
 0x161   :  { %2143 = vmatprep.subr.bf16.mxu0 %v2470_v0 }
 0x162   :  { %2128 = vmatpush3.bf16.msra.mxu1 %v2323_v8  ;;  %v2353_v8 = vld [vmem:[#allocation9 + $0x68] sm:$0xff]  }
 0x163   :  { %2153 = vmatprep.subr.bf16.mxu1 %v2470_v0 }
 0x164   :  { %2144 = vmatpush3.bf16.msra.mxu0 %v2322_v7  ;;  %v2352_v7 = vld [vmem:[#allocation9 + $0x20] sm:$0xff]  }
 0x165   :  { %2145 = vmatprep.subr.bf16.mxu0 %v2470_v0  ;;  %2130 = vmatmul.mubr.bf16.vlgmr.msra.gmra.mxu1 %v824_v19 }
 0x166   :  { %2154 = vmatpush3.bf16.msra.mxu1 %v2326_v16  ;;  %2169 = vmatprep.mubr.msk.bf16.mxu1 %vm2471_vm0, %v2470_v0  ;;  %v2360_v16 = vld [vmem:[#allocation9] sm:$0xff]  }
 0x167   :  { %2155 = vmatprep.subr.bf16.mxu1 %v2470_v0 }
 0x168   :  { %2146 = vmatpush3.bf16.msra.mxu0 %v2325_v15  ;;  %v2359_v15 = vld [vmem:[#allocation9 + $0x50] sm:$0xff]  }
 0x169   :  { %2147 = vmatprep.subr.bf16.mxu0 %v2470_v0 }
 0x16a   :  { %2156 = vmatpush3.bf16.msra.mxu1 %v2328_v21 }
 0x16b   :  { %2157 = vmatprep.subr.bf16.mxu1 %v2470_v0 }
 0x16c   :  { %2148 = vmatpush3.bf16.msra.mxu0 %v2327_v20 }
 0x16d   :  { %2173 = vmatprep.subr.bf16.mxu0 %v2470_v0 }
 0x16e   :  { %2158 = vmatpush3.bf16.msra.mxu1 %v2332_v26 }
 0x16f   :  { %2150 = vmatmul.mubr.bf16.vlgmr.msra.gmra.mxu0 %v1000_v23  ;;  %2159 = vmatprep.subr.bf16.mxu1 %v2470_v0 }
 0x170   :  { %2174 = vmatpush3.bf16.msra.mxu0 %v2331_v24  ;;  %2189 = vmatprep.mubr.msk.bf16.mxu0 %vm2471_vm0, %v2470_v0 }
 0x171   :  { %2175 = vmatprep.subr.bf16.mxu0 %v2470_v0 }
 0x172   :  { %2160 = vmatpush3.bf16.msra.mxu1 %v2334_v31 }
 0x173   :  { %2161 = vmatprep.subr.bf16.mxu1 %v2470_v0 }
 0x174   :  { %2176 = vmatpush3.bf16.msra.mxu0 %v2333_v27  ;;  %v2740_v27 = vld [vmem:[%s2778_s4] ss:$0 sm:$0xff]  ;;  %s2472_s4 = smov [#allocation10]  }
 0x175   :  { %2177 = vmatprep.subr.bf16.mxu0 %v2470_v0  ;;  %s1762_s12 = sshll.u32 %s2472_s4, 4  ;;  %s1763_s12 = int_to_ptr.vmem [resolvable:$true] %s1762_s12 }
 0x176   :  { %2162 = vmatpush3.bf16.msra.mxu1 %v2336_v33  ;;  %s2437_s13 = scalar_lea.vmem %s1763_s12, 512  ;;  %p2442_p2 = scmp.lt.s32.totalorder %s1763_s12, %s1763_s12 }
 0x177   :  { %2163 = vmatprep.subr.bf16.mxu1 %v2470_v0  ;;  %p2438_p1 = scmp.ne.s32.totalorder %s1763_s12, %s2437_s13  ;;  %p2443_p3 = scmp.lt.s32.totalorder %s2437_s13, %s2437_s13 }
 0x178   :  { %2178 = vmatpush3.bf16.msra.mxu0 %v2335_v32 }
 0x179   :  { %2179 = vmatprep.subr.bf16.mxu0 %v2470_v0  ;;  %p2444_p4 = por %p2443_p3, %p2442_p2 }
 0x17a   :  { %2164 = vmatpush3.bf16.msra.mxu1 %v2338_v38 }
 0x17b   :  { %2165 = vmatprep.subr.bf16.mxu1 %v2470_v0  ;;  %p2445_p5 = pnand %p2444_p4, %p2438_p1 }
 0x17c   :  { %2180 = vmatpush3.bf16.msra.mxu0 %v2337_v37 }
 0x17d   :  { %2181 = vmatprep.subr.bf16.mxu0 %v2470_v0 }
 0x17e   :  { %2166 = vmatpush3.bf16.msra.mxu1 %v2340_v44 }
 0x17f   :  { %2167 = vmatprep.subr.bf16.mxu1 %v2470_v0 }
 0x180   :  { %2182 = vmatpush3.bf16.msra.mxu0 %v2339_v43 }
 0x181   :  { %2183 = vmatprep.subr.bf16.mxu0 %v2470_v0 }
 0x182   :  { %2168 = vmatpush3.bf16.msra.mxu1 %v2342_v49 }
 0x183   :  { %2193 = vmatprep.subr.bf16.mxu1 %v2470_v0 }
 0x184   :  { %2184 = vmatpush3.bf16.msra.mxu0 %v2341_v48 }
 0x185   :  { %2185 = vmatprep.subr.bf16.mxu0 %v2470_v0  ;;  %2170 = vmatmul.mubr.bf16.vlgmr.msra.gmra.mxu1 %v1130_v52 }
 0x186   :  { %2209 = vmatprep.mubr.msk.bf16.mxu1 %vm2471_vm0, %v2470_v0  ;;  %2194 = vmatpush3.bf16.msra.mxu1 %v2347_v63 }
 0x187   :  { %2195 = vmatprep.subr.bf16.mxu1 %v2470_v0 }
 0x188   :  { %2186 = vmatpush3.bf16.msra.mxu0 %v2344_v53 }
 0x189   :  { %2187 = vmatprep.subr.bf16.mxu0 %v2470_v0 }
 0x18a   :  { %2196 = vmatpush3.bf16.msra.mxu1 %v2348_v1 }
 0x18b   :  { %2197 = vmatprep.subr.bf16.mxu1 %v2470_v0 }
 0x18c   :  { %2188 = vmatpush3.bf16.msra.mxu0 %v2345_v56 }
 0x18d   :  { %2213 = vmatprep.subr.bf16.mxu0 %v2470_v0 }
 0x18e   :  { %2198 = vmatpush3.bf16.msra.mxu1 %v2350_v3 }
 0x18f   :  { %2190 = vmatmul.mubr.bf16.vlgmr.msra.gmra.mxu0 %v1246_v60  ;;  %2199 = vmatprep.subr.bf16.mxu1 %v2470_v0 }
 0x190   :  { %2229 = vmatprep.mubr.msk.bf16.mxu0 %vm2471_vm0, %v2470_v0  ;;  %2214 = vmatpush3.bf16.msra.mxu0 %v2349_v2 }
 0x191   :  { %2215 = vmatprep.subr.bf16.mxu0 %v2470_v0 }
 0x192   :  { %2200 = vmatpush3.bf16.msra.mxu1 %v2352_v7 }
 0x193   :  { %2201 = vmatprep.subr.bf16.mxu1 %v2470_v0 }
 0x194   :  { %2216 = vmatpush3.bf16.msra.mxu0 %v2351_v5 }
 0x195   :  { %2217 = vmatprep.subr.bf16.mxu0 %v2470_v0 }
 0x196   :  { %2202 = vmatpush3.bf16.msra.mxu1 %v2354_v11 }
 0x197   :  { %2203 = vmatprep.subr.bf16.mxu1 %v2470_v0 }
 0x198   :  { %2218 = vmatpush3.bf16.msra.mxu0 %v2353_v8 }
 0x199   :  { %2219 = vmatprep.subr.bf16.mxu0 %v2470_v0 }
 0x19a   :  { %2204 = vmatpush3.bf16.msra.mxu1 %v2356_v13 }
 0x19b   :  { %2205 = vmatprep.subr.bf16.mxu1 %v2470_v0 }
 0x19c   :  { %2220 = vmatpush3.bf16.msra.mxu0 %v2355_v12 }
 0x19d   :  { %2221 = vmatprep.subr.bf16.mxu0 %v2470_v0 }
 0x19e   :  { %2206 = vmatpush3.bf16.msra.mxu1 %v2358_v14 }
 0x19f   :  { %2207 = vmatprep.subr.bf16.mxu1 %v2470_v0 }
 0x1a0   :  { %2222 = vmatpush3.bf16.msra.mxu0 %v2357_v34 }
 0x1a1   :  { %2223 = vmatprep.subr.bf16.mxu0 %v2470_v0 }
 0x1a2   :  { %2208 = vmatpush3.bf16.msra.mxu1 %v2360_v16 }
 0x1a3   :  { %2233 = vmatprep.subr.bf16.mxu1 %v2470_v0 }
 0x1a4   :  { %2224 = vmatpush3.bf16.msra.mxu0 %v2359_v15 }
 0x1a5   :  { %2225 = vmatprep.subr.bf16.mxu0 %v2470_v0 }
 0x1a8   :  { %2226 = vmatpush3.bf16.msra.mxu0 %v2361_v17  ;;  %v1373_v17 = vld [vmem:[#allocation3 + $0x8] sm:$0xe] }
 0x1a9   :  { %2227 = vmatprep.subr.bf16.mxu0 %v2470_v0 }
 0x1ac   :  { %2228 = vmatpush3.bf16.msra.mxu0 %v2365_v18 }
 0x205   :  { %v660_v19 = vpop.f32.mrf.mxu1 }
 0x206   :  { %v667_v31 = vadd.f32 %v2740_v27, %v660_v19 }
 0x207   :  { %v2091_v20 = vpop.f32.mrf.mxu1 }
 0x209   :  { %v663_v21 = vpop.f32.mrf.mxu1 }
 0x20a   :  { %v668_v35 = vadd.f32 %v2740_v27, %v663_v21 }
 0x20b   :  { %v2092_v22 = vpop.f32.mrf.mxu1 }
 0x20f   :  { %v792_v10 = vpop.f32.mrf.mxu0 }
 0x210   :  { %v799_v32 = vadd.f32 %v792_v10, %v667_v31 }
 0x211   :  { %v2111_v23 = vpop.f32.mrf.mxu0 }
 0x213   :  { %v795_v24 = vpop.f32.mrf.mxu0 }
 0x214   :  { %v800_v39 = vadd.f32 %v795_v24, %v668_v35  ;;  %v1377_v24 = vld [vmem:[#allocation3 + $0x10] sm:$0x3] }
 0x215   :  { %v2112_v26 = vpop.f32.mrf.mxu0 }
 0x225   :  { %v908_v33 = vpop.f32.mrf.mxu1 }
 0x226   :  { %v915_v37 = vadd.f32 %v908_v33, %v799_v32 }
 0x227   :  { %v2131_v38 = vpop.f32.mrf.mxu1 }
 0x228   :  { %v917_v41 = vadd.f32 %v2375_v40, %v915_v37 }
 0x229   :  { %v911_v42 = vpop.f32.mrf.mxu1 }
 0x22a   :  { %vm919_vm9 = vcmp.gt.f32.partialorder %v917_v41, 0.0  ;;  %v921_v43 = vmul.f32 0.1, %v917_v41  ;;  %v916_v44 = vadd.f32 %v911_v42, %v800_v39 }
 0x22b   :  { %v2132_v45 = vpop.f32.mrf.mxu1 }
 0x22c   :  { %v923_v29 = vsel %vm919_vm9, %v917_v41, %v921_v43  ;;  %v918_v47 = vadd.f32 %v2376_v46, %v916_v44  ;;  %v2364_v41 = vld [vmem:[#allocation9 + $0xb8] sm:$0xff]  }
 0x22d   :  { %925 = vst [vmem:[#allocation10] sm:$0xff] %v923_v29 }
 0x22e   :  { %vm920_vm10 = vcmp.gt.f32.partialorder %v918_v47, 0.0  ;;  %v922_v49 = vmul.f32 0.1, %v918_v47 }
 0x22f   :  { %v1084_v48 = vpop.f32.mrf.mxu0 }
 0x230   :  { %v924_v9 = vsel %vm920_vm10, %v918_v47, %v922_v49  ;;  %v1091_v58 = vadd.f32 %v2651_v4, %v1084_v48  ;;  %v2367_v49 = vld [vmem:[#allocation9 + $0xb0] sm:$0xff]  }
 0x231   :  { %v2151_v51 = vpop.f32.mrf.mxu0  ;;  %926 = vst [vmem:[#allocation10 + $0x8] sm:$0xff] %v924_v9 }
 0x233   :  { %v1087_v25 = vpop.f32.mrf.mxu0 }
 0x234   :  { %v1092_v62 = vadd.f32 %v2651_v4, %v1087_v25  ;;  %v2368_v25 = vld [vmem:[#allocation9 + $0xa8] sm:$0xff]  }
 0x235   :  { %v2152_v52 = vpop.f32.mrf.mxu0 }
 0x236   :  { %v2369_v52 = vld [vmem:[#allocation9 + $0xa0] sm:$0xff]  }
 0x245   :  { %v1214_v53 = vpop.f32.mrf.mxu1 }
 0x246   :  { %v1221_v60 = vadd.f32 %v1214_v53, %v1091_v58  ;;  %v2370_v53 = vld [vmem:[#allocation9 + $0x98] sm:$0xff]  }
 0x247   :  { %v2171_v55 = vpop.f32.mrf.mxu1 }
 0x248   :  { %v2371_v55 = vld [vmem:[#allocation9 + $0x90] sm:$0xff]  }
 0x249   :  { %v1217_v56 = vpop.f32.mrf.mxu1 }
 0x24a   :  { %v1222_v2 = vadd.f32 %v1217_v56, %v1092_v62  ;;  %v2372_v56 = vld [vmem:[#allocation9 + $0x88] sm:$0xff]  }
 0x24b   :  { %v2172_v59 = vpop.f32.mrf.mxu1 }
 0x24f   :  { %v1330_v61 = vpop.f32.mrf.mxu0 }
 0x250   :  { %v1337_v63 = vadd.f32 %v1330_v61, %v1221_v60  ;;  %v2373_v60 = vld [vmem:[#allocation9 + $0x80] sm:$0xff]  }
 0x251   :  { %v2191_v1 = vpop.f32.mrf.mxu0 }
 0x252   :  { %vm1339_vm14 = vcmp.gt.f32.partialorder %v1337_v63, 0.0  ;;  %v1341_v3 = vmul.f32 0.4, %v1337_v63 }
 0x253   :  { %v1333_v5 = vpop.f32.mrf.mxu0 }
 0x254   :  { %v1343_v6 = vsel %vm1339_vm14, %v1337_v63, %v1341_v3  ;;  %v1338_v30 = vadd.f32 %v1333_v5, %v1222_v2 }
 0x255   :  { %v1903_v7 = vpack.c.bf16 %v1343_v6, %v1343_v6  ;;  %v2192_v8 = vpop.f32.mrf.mxu0 }
 0x256   :  { %vm1340_vm1 = vcmp.gt.f32.partialorder %v1338_v30, 0.0  ;;  %v1342_v11 = vmul.f32 0.4, %v1338_v30 }
 0x257   :  { %v1352_v12 = vshrl.u32 %v1903_v7, 16  ;;  %v1355_v13 = vshll.u32 %v1903_v7, 16 }
 0x258   :  { %v1344_v34 = vsel %vm1340_vm1, %v1338_v30, %v1342_v11 }
 0x259   :  { %v1354_v14 = vrot.slane %v1352_v12, 6  ;;  %v1357_v15 = vrot.slane %v1355_v13, 7  ;;  %v1904_v16 = vpack.c.bf16 %v1344_v34, %v1344_v34 }
 0x25b   :  { %v1358_v4 = vor.u32 %v1357_v15, %v1354_v14  ;;  %v1361_v18 = vshrl.u32 %v1904_v16, 16  ;;  %v1364_v19 = vshll.u32 %v1904_v16, 16 }
 0x25d   :  { %v1374_v20 = vsel %vm2635_vm7, %v1358_v4, %v1373_v17  ;;  %v1363_v21 = vrot.slane %v1361_v18, 6  ;;  %v1366_v22 = vrot.slane %v1364_v19, 7  ;;  %v1359_v10 = vrot.slane %v1358_v4, 4 }
 0x25e   :  { %1375 = vst [vmem:[#allocation3 + $0x8] sm:$0xe] %v1374_v20 }
 0x25f   :  { %v1367_v23 = vor.u32 %v1366_v22, %v1363_v21 }
 0x261   :  { %v1368_v26 = vsel %vm2628_vm5, %v1359_v10, %v1367_v23  ;;  %v1369_v31 = vrot.slane %v1367_v23, 4 }
 0x262   :  { %1376 = vst [vmem:[#allocation3 + $0xc] sm:$0xf] %v1368_v26 }
 0x263   :  { %v1378_v32 = vsel %vm2642_vm12, %v1369_v31, %v1377_v24 }
 0x264   :  { %1379 = vst [vmem:[#allocation3 + $0x10] sm:$0x3] %v1378_v32 }
 0x265   :  { %v1380_v33 = vld [vmem:[#allocation3 + $0x8] sm:$0xe] }
 0x266   :  { %v1631_v58 = vld [vmem:[#allocation3 + $0x8] sm:$0xc] }
 0x269   :  { %v1381_v35 = vld [vmem:[#allocation3 + $0xc] sm:$0xf] }
 0x26a   :  { %v1869_v37 = vcombine.low %v1380_v33, %v1381_v35  ;;  %v1888_v59 = vcombine.low %v1631_v58, %v1381_v35 }
 0x26b   :  { %v2363_v54 = vld [vmem:[#allocation3 + $0x10] ss:$0 sps:$4 sm:$0x11]  }
 0x26c   :  { %v1407_v38 = vrot.slane %v1869_v37, 1  ;;  %v2366_v39 = vld [vmem:[#allocation3 + $0x10] ss:$0 sps:$4 sm:$0x33]   ;;  %v1408_v40 = vrot.slane %v2363_v54, 1  ;;  %v1523_v42 = vshrl.u32 %v1869_v37, 16 }
 0x26d   :  { %v1526_v43 = vshll.u32 %v1869_v37, 16  ;;  %v1531_v44 = vshrl.u32 %v2366_v39, 16  ;;  %v1534_v45 = vshll.u32 %v2366_v39, 16  ;;  %v1651_v61 = vrot.slane %v1888_v59, 2 }
 0x26e   :  { %v1409_v50 = vsel %vm419_vm11, %v1407_v38, %v1408_v40  ;;  %v1525_v29 = vrot.slane %v1523_v42, 1  ;;  %v1652_v62 = vrot.slane %v2366_v39, 2 }
 0x26f   :  { %v1528_v46 = vrot.slane %v1526_v43, 2  ;;  %2210 = vmatmul.mubr.bf16.vlgmr.msra.gmra.mxu1 %v1409_v50  ;;  %v1533_v57 = vrot.slane %v1531_v44, 1  ;;  %v1536_v47 = vrot.slane %v1534_v45, 2 }
 0x270   :  { %2234 = vmatpush3.bf16.msra.mxu1 %v2364_v41  ;;  %2249 = vmatprep.mubr.msk.bf16.mxu1 %vm2471_vm0, %v2470_v0  ;;  %v1653_v63 = vsel %vm1243_vm8, %v1651_v61, %v1652_v62 }
 0x271   :  { %v1529_v48 = vor.u32 %v1528_v46, %v1525_v29  ;;  %2235 = vmatprep.subr.bf16.mxu1 %v2470_v0  ;;  %v1537_v51 = vor.u32 %v1536_v47, %v1533_v57 }
 0x273   :  { %v1538_v9 = vsel %vm1113_vm4, %v1529_v48, %v1537_v51 }
 0x274   :  { %2230 = vmatmul.mubr.bf16.vlgmr.msra.gmra.mxu0 %v1538_v9  ;;  %2236 = vmatpush3.bf16.msra.mxu1 %v2367_v49 }
 0x275   :  { %2237 = vmatprep.subr.bf16.mxu1 %v2470_v0 }
 0x278   :  { %2238 = vmatpush3.bf16.msra.mxu1 %v2368_v25 }
 0x279   :  { %2239 = vmatprep.subr.bf16.mxu1 %v2470_v0 }
 0x27c   :  { %2240 = vmatpush3.bf16.msra.mxu1 %v2369_v52 }
 0x27d   :  { %2241 = vmatprep.subr.bf16.mxu1 %v2470_v0 }
 0x280   :  { %2242 = vmatpush3.bf16.msra.mxu1 %v2370_v53 }
 0x281   :  { %2243 = vmatprep.subr.bf16.mxu1 %v2470_v0 }
 0x284   :  { %2244 = vmatpush3.bf16.msra.mxu1 %v2371_v55 }
 0x285   :  { %2245 = vmatprep.subr.bf16.mxu1 %v2470_v0 }
 0x288   :  { %2246 = vmatpush3.bf16.msra.mxu1 %v2372_v56 }
 0x289   :  { %2247 = vmatprep.subr.bf16.mxu1 %v2470_v0 }
 0x28c   :  { %2248 = vmatpush3.bf16.msra.mxu1 %v2373_v60 }
 0x28f   :  { %2250 = vmatmul.mubr.bf16.vlgmr.msra.gmra.mxu1 %v1653_v63 }
 0x32f   :  { %v1493_v1 = vpop.f32.mrf.mxu1 }
 0x330   :  { %v1500_v11 = vadd.f32 %v2740_v27, %v1493_v1 }
 0x331   :  { %v2211_v2 = vpop.f32.mrf.mxu1 }
 0x333   :  { %v1496_v3 = vpop.f32.mrf.mxu1 }
 0x334   :  { %v1622_v5 = vpop.f32.mrf.mxu0  ;;  %v1501_v0 = vadd.f32 %v2740_v27, %v1496_v3 }
 0x335   :  { %v2212_v6 = vpop.f32.mrf.mxu1  ;;  %v1629_v12 = vadd.f32 %v1622_v5, %v1500_v11 }
 0x336   :  { %v2231_v30 = vpop.f32.mrf.mxu0 }
 0x338   :  { %v1625_v7 = vpop.f32.mrf.mxu0 }
 0x339   :  { %v1630_v15 = vadd.f32 %v1625_v7, %v1501_v0 }
 0x33a   :  { %v2232_v8 = vpop.f32.mrf.mxu0 }
 0x34f   :  { %v1737_v13 = vpop.f32.mrf.mxu1 }
 0x350   :  { %v1744_v34 = vadd.f32 %v1737_v13, %v1629_v12 }
 0x351   :  { %v2251_v14 = vpop.f32.mrf.mxu1 }
 0x352   :  { %v1746_v16 = vadd.f32 %v1744_v34, %v2605_v28 }
 0x353   :  { %v1740_v17 = vpop.f32.mrf.mxu1 }
 0x354   :  { %vm1748_vm0 = vcmp.gt.f32.partialorder %v1746_v16, 0.0  ;;  %v1750_v4 = vmul.f32 0.1, %v1746_v16  ;;  %v1745_v18 = vadd.f32 %v1740_v17, %v1630_v15 }
 0x355   :  { %v2252_v19 = vpop.f32.mrf.mxu1 }
 0x356   :  { %v1752_v20 = vsel %vm1748_vm0, %v1746_v16, %v1750_v4  ;;  %v1747_v21 = vadd.f32 %v1745_v18, %v2621_v36 }
 0x357   :  { %1755 = vst [vmem:[#allocation10 + $0x10] sm:$0xff] %v1752_v20 }
 0x358   :  { %vm1749_vm11 = vcmp.gt.f32.partialorder %v1747_v21, 0.0  ;;  %v1751_v22 = vmul.f32 0.1, %v1747_v21 }
 0x35a   :  { %v1753_v27 = vsel %vm1749_vm11, %v1747_v21, %v1751_v22 }
 0x35b   :  { %1756 = vst [vmem:[#allocation10 + $0x18] sm:$0xff] %v1753_v27 }
 0x35c   :  { %2448 = shalt.err (!%p2445_p5)
}
 0x35d   :  { %1768 = dma.vmem_to_hbm [thread:$0]  %s1763_s12, 512, %s2779_s5, [#allocation6], %s2467_s28, %s2467_s28, %s2468_s29  }
 0x35e   :  { %2461 = dma.done.wait [#allocation6], 512  }
 0x35f   :  { %2462 = vsyncadd [#allocation6], 4294966784 }
 0x360   :  { %1772 = vsyncpa [#allocation5], 1 }
 0x361   :  { %1773 = vsyncpa [#allocation8], 1 }
 0x362   :  { %1774 = vsyncpa [#allocation6], 1 }

</bundles_post_ra>
